<compile_context>
chip_gen: v7x
topology: tpu7x:2x2x1
jax: 0.10.0
libtpu: 0.0.40
codegen_flags: <defaults>
</compile_context>

<pallas_src>
import math

import jax
import jax.numpy as jnp
from jax.experimental import pallas as pl
from jax.experimental.pallas import tpu as pltpu

QDIM = 32                  # attention embed_dim / question embedding dim
KDIM = 3 * QDIM            # key/value dim = concat(question, response, answer)
NUM_HEADS = 4
HEAD_DIM = QDIM // NUM_HEADS
MAX_SEQ_LENGTH = 16
NUM_APIS = 10
SEQ_LEN = 8
LN_EPS = 1e-5
LANES = 128                # lane padding for the prediction head / output store

BB = 8                     # sequences per grid step (batch block)
RB = BB * SEQ_LEN          # 64  flattened rows per block        (bl, i)
TB = NUM_HEADS * RB        # 256 head-expanded key columns       (h, bl, j)
SLAB_LANES = max(LANES, TB)

# ---- packed weight-slab row offsets (all multiples of 8 for aligned loads) ----
ROW_WQKV = 0                       # (KDIM, 3*QDIM)  fused q|k|v in-proj (q pre-scaled)
ROW_ADD = ROW_WQKV + KDIM          # (RB, 3*QDIM)    per-row add: q pos-correction + biases
ROW_REP = ROW_ADD + RB             # (TB, RB)        one-hot row-replication matrix
ROW_KVMASK = ROW_REP + TB          # (TB, 2*QDIM)    head feature mask for [k|v]
ROW_SUMMASK = ROW_KVMASK + TB      # (TB, TB)        per-(head,seq) softmax-sum mask
ROW_SEQSEL = ROW_SUMMASK + TB      # (RB, TB)        same-sequence selector
ROW_WOF = ROW_SEQSEL + RB          # (QDIM, 2*QDIM)  fused [out-proj | out-proj@ff1]
ROW_WP = ROW_WOF + QDIM            # (QDIM, LANES)   prediction head, zero padded
ROW_MISC = ROW_WP + QDIM           # (8, SLAB_LANES) b_of, ln_w, ln_b, bp
SLAB_ROWS = ROW_MISC + 8           # 1064 (multiple of 8)

FLOPS_PER_BLOCK = 2 * (
    RB * KDIM * 3 * QDIM       # fused q|k|v in-projection
    + TB * RB * 2 * QDIM       # head replication matmul
    + RB * QDIM * TB           # scores
    + RB * TB * TB             # softmax denominators
    + RB * TB * QDIM           # attention @ V
    + RB * QDIM * 2 * QDIM     # fused out-proj + ff1
    + RB * QDIM * LANES        # prediction head
)


def _saokt_kernel(x_ref, slab_ref, out_ref):
    """BB sequences of SAOKT forward per grid step, everything VMEM-resident."""
    x = x_ref[...]                                                  # (RB, KDIM)

    # ---- static slices of the packed slab (aligned row starts, lane offset 0) ----
    w_qkv = slab_ref[ROW_WQKV:ROW_WQKV + KDIM, :3 * QDIM]
    add_qkv = slab_ref[ROW_ADD:ROW_ADD + RB, :3 * QDIM]
    rep = slab_ref[ROW_REP:ROW_REP + TB, :RB]
    kv_mask2 = slab_ref[ROW_KVMASK:ROW_KVMASK + TB, :2 * QDIM]
    sum_mask = slab_ref[ROW_SUMMASK:ROW_SUMMASK + TB, :TB]
    seq_sel = slab_ref[ROW_SEQSEL:ROW_SEQSEL + RB, :TB]
    w_of = slab_ref[ROW_WOF:ROW_WOF + QDIM, :2 * QDIM]
    wp = slab_ref[ROW_WP:ROW_WP + QDIM, :LANES]
    misc = slab_ref[ROW_MISC:ROW_MISC + 8, :]
    b_of = misc[0:1, :2 * QDIM]
    lnw = misc[1:2, :QDIM]
    lnb = misc[2:3, :QDIM]
    bp = misc[3:4, :LANES]

    # ---- fused q|k|v in-projection (q is pre-scaled and pos-corrected via add_qkv) ----
    qkv = jnp.dot(x, w_qkv, preferred_element_type=jnp.float32) + add_qkv   # (RB, 3Q)
    q_s = qkv[:, :QDIM]                                                     # scaled queries
    kv = qkv[:, QDIM:3 * QDIM]                                              # (RB, 2Q) = [k|v]

    # ---- head-expanded key/value slab: rows ordered (head, seq, pos) ----
    # rep is one-hot -> exact row replication; kv_mask2 zeroes non-head features.
    kv_big = jnp.dot(rep, kv, preferred_element_type=jnp.float32) * kv_mask2  # (TB, 2Q)
    k_bd = kv_big[:, :QDIM]
    v_bd = kv_big[:, QDIM:2 * QDIM]

    # ---- all heads x all sequences in one score block ----
    # scores[bl*S+i, h*RB + bl'*S + j] = scale * <q_h[bl,i], k_h[bl',j]>
    scores = jax.lax.dot_general(q_s, k_bd, (((1,), (1,)), ((), ())),
                                 preferred_element_type=jnp.float32)        # (RB, TB)

    # Per-(head, sequence) softmax: a global per-row shift is valid for every block.
    m = jnp.max(scores, axis=-1, keepdims=True)
    p = jnp.exp(scores - m)
    # denom[., (h,bl',.)] = sum_j exp(score[., (h,bl',j)])  (always > 0, no NaNs)
    denom = jnp.dot(p, sum_mask, preferred_element_type=jnp.float32)        # (RB, TB)
    # normalize, then zero cross-sequence probabilities (divide-before-mask).
    pn = (p / denom) * seq_sel
    attn = jnp.dot(pn, v_bd, preferred_element_type=jnp.float32)            # (RB, Q)

    # ---- fused out-proj + ff1 (no nonlinearity between them) ----
    y = jnp.dot(attn, w_of, preferred_element_type=jnp.float32) + b_of      # (RB, 2Q)
    res = y[:, :QDIM]
    ff = jnp.maximum(y[:, QDIM:2 * QDIM], 0.0)
    # TODO(synk): dropout layers are identity at inference; training-mode dropout
    # (and the PyTorch debug print) are not implemented.

    def layernorm(z):
        mu = jnp.mean(z, axis=-1, keepdims=True)
        var = jnp.mean((z - mu) ** 2, axis=-1, keepdims=True)
        return (z - mu) * jax.lax.rsqrt(var + LN_EPS) * lnw + lnb

    out = layernorm(ff + layernorm(res))

    # ---- prediction head, zero-padded to 128 lanes => unmasked full-lane store ----
    logits = jnp.dot(out, wp, preferred_element_type=jnp.float32) + bp      # (RB, 128)
    out_ref[...] = logits.astype(out_ref.dtype)


def init_params(key):
    """Deterministic synthetic parameters matching SAOKT.__init__ shapes."""
    ks = jax.random.split(key, 16)

    def w(k, shape, scale=0.05):
        return jax.random.normal(k, shape, jnp.float32) * scale

    return dict(
        pos_emb=w(ks[0], (MAX_SEQ_LENGTH + 1, KDIM)),        # positional_embedding
        resp_emb=w(ks[1], (NUM_APIS, QDIM)),                 # response_embedding
        ans_emb=w(ks[2], (NUM_APIS, QDIM)),                  # answer_embedding (unused in forward, per spec)
        wq=w(ks[3], (QDIM, QDIM)),                           # matn.q_proj_weight
        wk=w(ks[4], (QDIM, KDIM)),                           # matn.k_proj_weight
        wv=w(ks[5], (QDIM, KDIM)),                           # matn.v_proj_weight
        in_bias=w(ks[6], (3 * QDIM,)),                       # matn.in_proj_bias
        wo=w(ks[7], (QDIM, QDIM)),                           # matn.out_proj.weight
        bo=w(ks[8], (QDIM,)),                                # matn.out_proj.bias
        wff=w(ks[9], (QDIM, QDIM)),                          # ff1.weight
        bff=w(ks[10], (QDIM,)),                              # ff1.bias
        ln_w=jnp.ones((QDIM,), jnp.float32) + w(ks[11], (QDIM,)),  # layernorm.weight
        ln_b=w(ks[12], (QDIM,)),                             # layernorm.bias
        wp=w(ks[13], (MAX_SEQ_LENGTH, QDIM)),                # prediction.weight
        bp=w(ks[14], (MAX_SEQ_LENGTH,)),                     # prediction.bias
    )


def _build_slab(params):
    """Pack every weight/bias/mask into one (SLAB_ROWS, SLAB_LANES) f32 slab."""
    f32 = jnp.float32
    scale = 1.0 / math.sqrt(HEAD_DIM)

    def padc(a):
        a = jnp.asarray(a, f32)
        return jnp.pad(a, ((0, 0), (0, SLAB_LANES - a.shape[1])))

    bq, bk, bv = jnp.split(jnp.asarray(params["in_bias"], f32), 3)
    wqT = jnp.asarray(params["wq"], f32).T      # (Q, Q)
    wkT = jnp.asarray(params["wk"], f32).T      # (KDIM, Q)
    wvT = jnp.asarray(params["wv"], f32).T      # (KDIM, Q)

    # fused in-projection: x @ [scale*Wq_ext | Wk.T | Wv.T]
    wq_ext = jnp.concatenate([wqT * scale, jnp.zeros((KDIM - QDIM, QDIM), f32)], axis=0)
    w_qkv = jnp.concatenate([wq_ext, wkT, wvT], axis=1)                       # (KDIM, 3Q)

    # per-row additive term: q column gets scale*(bq - pos_q@Wq.T) (removes the
    # positional embedding that rides along in x[:, :QDIM]); k/v columns get biases.
    pos_q = jnp.asarray(params["pos_emb"], f32)[:SEQ_LEN, :QDIM]              # (S, Q)
    q_add = scale * (bq[None, :] - pos_q @ wqT)                               # (S, Q)
    add_seq = jnp.concatenate(
        [q_add, jnp.tile(bk[None, :], (SEQ_LEN, 1)), jnp.tile(bv[None, :], (SEQ_LEN, 1))],
        axis=1)                                                               # (S, 3Q)
    add_qkv = jnp.tile(add_seq, (BB, 1))                                      # (RB, 3Q)

    # masks: expanded column t = h*RB + bl*S + j ; flattened row r = bl*S + i
    t = jnp.arange(TB)
    r = jnp.arange(RB)
    rep = (t[:, None] % RB == r[None, :]).astype(f32)                         # (TB, RB)
    hm = (t[:, None] // RB == jnp.arange(QDIM)[None, :] // HEAD_DIM).astype(f32)  # (TB, Q)
    kv_mask2 = jnp.concatenate([hm, hm], axis=1)                              # (TB, 2Q)
    sum_mask = (t[:, None] // SEQ_LEN == t[None, :] // SEQ_LEN).astype(f32)   # (TB, TB)
    seq_sel = (r[:, None] // SEQ_LEN == (t[None, :] % RB) // SEQ_LEN).astype(f32)  # (RB, TB)

    # fused out-proj + ff1
    woT = jnp.asarray(params["wo"], f32).T
    wffT = jnp.asarray(params["wff"], f32).T
    w_of = jnp.concatenate([woT, woT @ wffT], axis=1)                         # (Q, 2Q)
    b_of = jnp.concatenate([params["bo"], params["bo"] @ wffT + params["bff"]])  # (2Q,)

    wpT = jnp.asarray(params["wp"], f32).T                                    # (Q, 16)

    misc = jnp.zeros((8, SLAB_LANES), f32)
    misc = misc.at[0, :2 * QDIM].set(b_of)
    misc = misc.at[1, :QDIM].set(params["ln_w"])
    misc = misc.at[2, :QDIM].set(params["ln_b"])
    misc = misc.at[3, :MAX_SEQ_LENGTH].set(params["bp"])

    slab = jnp.concatenate([
        padc(w_qkv),       # ROW_WQKV
        padc(add_qkv),     # ROW_ADD
        padc(rep),         # ROW_REP
        padc(kv_mask2),    # ROW_KVMASK
        padc(sum_mask),    # ROW_SUMMASK
        padc(seq_sel),     # ROW_SEQSEL
        padc(w_of),        # ROW_WOF
        padc(wpT),         # ROW_WP
        misc,              # ROW_MISC
    ], axis=0)
    assert slab.shape == (SLAB_ROWS, SLAB_LANES)
    return slab


def saokt_forward(params, question_sequence, response_sequence, answer_sequence):
    """Batched is_embedded=True forward: question/response (B,S,QDIM) f32, answer (B,S) int."""
    B, S, _ = question_sequence.shape
    assert S == SEQ_LEN

    # Wrapper glue (XLA fuses these): embedding gather + concat + positional add.
    # Spec uses response_embedding(answer_sequence) -- kept as-is.
    a_emb = params["resp_emb"][answer_sequence]                               # (B, S, QDIM)
    pos = params["pos_emb"][:S]                                               # (S, KDIM)
    x = jnp.concatenate([question_sequence, response_sequence, a_emb], axis=-1) + pos[None]

    n_blocks = pl.cdiv(B, BB)
    B_pad = n_blocks * BB
    if B_pad != B:
        x = jnp.pad(x, ((0, B_pad - B), (0, 0), (0, 0)))
    x_flat = x.reshape(B_pad * S, KDIM).astype(jnp.float32)

    slab = _build_slab(params)

    cost = pl.CostEstimate(
        flops=int(n_blocks * FLOPS_PER_BLOCK),
        transcendentals=int(n_blocks * (RB * TB + 2 * RB)),
        bytes_accessed=int(x_flat.size * 4 + SLAB_ROWS * SLAB_LANES * 4
                           + B_pad * S * LANES * 4),
    )

    out = pl.pallas_call(
        _saokt_kernel,
        out_shape=jax.ShapeDtypeStruct((B_pad * S, LANES), jnp.float32),
        grid=(n_blocks,),
        in_specs=[
            pl.BlockSpec((RB, KDIM), lambda g: (g, 0)),
            pl.BlockSpec((SLAB_ROWS, SLAB_LANES), lambda g: (0, 0)),   # VMEM-resident slab
        ],
        out_specs=pl.BlockSpec((RB, LANES), lambda g: (g, 0)),
        compiler_params=pltpu.CompilerParams(
            # On v7x, CORE_PARALLEL here would shard the >=2 batch blocks across
            # the two TensorCores; "parallel" is kept for v5e/v6e portability.
            dimension_semantics=("parallel",),
        ),
        cost_estimate=cost,
    )(x_flat, slab)
    return out.reshape(B_pad, S, LANES)[:B, :, :MAX_SEQ_LENGTH]


def saokt_reference(params, question, response, answer):
    """Pure-JAX reference of the PyTorch forward (inference: dropout = identity)."""
    a_emb = params["resp_emb"][answer]
    pos = params["pos_emb"][:question.shape[1]]
    x = jnp.concatenate([question, response, a_emb], axis=-1) + pos[None]
    bq, bk, bv = jnp.split(params["in_bias"], 3)
    q = question @ params["wq"].T + bq
    k = x @ params["wk"].T + bk
    v = x @ params["wv"].T + bv
    B, S, _ = q.shape
    qh = q.reshape(B, S, NUM_HEADS, HEAD_DIM).transpose(0, 2, 1, 3)
    kh = k.reshape(B, S, NUM_HEADS, HEAD_DIM).transpose(0, 2, 1, 3)
    vh = v.reshape(B, S, NUM_HEADS, HEAD_DIM).transpose(0, 2, 1, 3)
    s = jnp.einsum("bhqd,bhkd->bhqk", qh, kh) / math.sqrt(HEAD_DIM)
    p = jax.nn.softmax(s, axis=-1)
    o = jnp.einsum("bhqk,bhkd->bhqd", p, vh).transpose(0, 2, 1, 3).reshape(B, S, QDIM)
    res = o @ params["wo"].T + params["bo"]
    ff = jax.nn.relu(res @ params["wff"].T + params["bff"])

    def ln(z):
        mu = z.mean(-1, keepdims=True)
        var = ((z - mu) ** 2).mean(-1, keepdims=True)
        return (z - mu) * jax.lax.rsqrt(var + LN_EPS) * params["ln_w"] + params["ln_b"]

    out = ff + ln(res)
    out = ln(out)
    return out @ params["wp"].T + params["bp"]


if __name__ == "__main__":
    key = jax.random.PRNGKey(0)
    kp, kq, kr, ka = jax.random.split(key, 4)
    params = init_params(kp)

    B = 16   # two grid steps of BB=8 sequences each
    question = jax.random.normal(kq, (B, SEQ_LEN, QDIM), jnp.float32)   # pre-embedded questions
    response = jax.random.normal(kr, (B, SEQ_LEN, QDIM), jnp.float32)   # pre-embedded responses
    answer = jax.random.randint(ka, (B, SEQ_LEN), 0, NUM_APIS, jnp.int32)

    logits = jax.jit(saokt_forward)(params, question, response, answer)
    jax.block_until_ready(logits)
    assert logits.shape == (B, SEQ_LEN, MAX_SEQ_LENGTH)
    assert bool(jnp.all(jnp.isfinite(logits)))

    ref = saokt_reference(params, question, response, answer)
    assert bool(jnp.allclose(logits, ref, atol=2e-2, rtol=2e-2)), \
        float(jnp.max(jnp.abs(logits - ref)))
    print("KERNEL_OK")
</pallas_src>

<mosaic_0001>
module attributes {stable_mosaic.version = 11 : i64} {
  func.func @_saokt_kernel(%arg0: i32, %arg1: memref<64x96xf32, #tpu.memory_space<vmem>>, %arg2: memref<1064x256xf32, #tpu.memory_space<vmem>>, %arg3: memref<64x128xf32, #tpu.memory_space<vmem>>) attributes {dimension_semantics = [#tpu.dimension_semantics<parallel>], iteration_bounds = array<i64: 2>, scalar_prefetch = 0 : i64, scratch_operands = 0 : i64, tpu.core_type = #tpu.core_type<tc>, window_params = [{transform_indices = @transform_0, window_bounds = array<i64: 64, 96>}, {pipeline_mode = #tpu.pipeline_mode<synchronous>, transform_indices = @transform_1, window_bounds = array<i64: 1064, 256>}, {transform_indices = @transform_2, window_bounds = array<i64: 64, 128>}]} {
    %c0 = arith.constant 0 : index
    %c0_0 = arith.constant 0 : index
    %0 = vector.load %arg1[%c0, %c0_0] : memref<64x96xf32, #tpu.memory_space<vmem>>, vector<64x96xf32>
    %c0_1 = arith.constant 0 : index
    %c0_2 = arith.constant 0 : index
    %1 = vector.load %arg2[%c0_1, %c0_2] : memref<1064x256xf32, #tpu.memory_space<vmem>>, vector<96x96xf32>
    %c96 = arith.constant 96 : index
    %c0_3 = arith.constant 0 : index
    %2 = vector.load %arg2[%c96, %c0_3] : memref<1064x256xf32, #tpu.memory_space<vmem>>, vector<64x96xf32>
    %c160 = arith.constant 160 : index
    %c0_4 = arith.constant 0 : index
    %3 = vector.load %arg2[%c160, %c0_4] : memref<1064x256xf32, #tpu.memory_space<vmem>>, vector<256x64xf32>
    %c416 = arith.constant 416 : index
    %c0_5 = arith.constant 0 : index
    %4 = vector.load %arg2[%c416, %c0_5] : memref<1064x256xf32, #tpu.memory_space<vmem>>, vector<256x64xf32>
    %c672 = arith.constant 672 : index
    %c0_6 = arith.constant 0 : index
    %5 = vector.load %arg2[%c672, %c0_6] : memref<1064x256xf32, #tpu.memory_space<vmem>>, vector<256x256xf32>
    %c928 = arith.constant 928 : index
    %c0_7 = arith.constant 0 : index
    %6 = vector.load %arg2[%c928, %c0_7] : memref<1064x256xf32, #tpu.memory_space<vmem>>, vector<64x256xf32>
    %c992 = arith.constant 992 : index
    %c0_8 = arith.constant 0 : index
    %7 = vector.load %arg2[%c992, %c0_8] : memref<1064x256xf32, #tpu.memory_space<vmem>>, vector<32x64xf32>
    %c1024 = arith.constant 1024 : index
    %c0_9 = arith.constant 0 : index
    %8 = vector.load %arg2[%c1024, %c0_9] : memref<1064x256xf32, #tpu.memory_space<vmem>>, vector<32x128xf32>
    %c1056 = arith.constant 1056 : index
    %c0_10 = arith.constant 0 : index
    %9 = vector.load %arg2[%c1056, %c0_10] : memref<1064x256xf32, #tpu.memory_space<vmem>>, vector<8x256xf32>
    %10 = vector.extract_strided_slice %9 {offsets = [0, 0], sizes = [1, 64], strides = [1, 1]} : vector<8x256xf32> to vector<1x64xf32>
    %11 = vector.extract_strided_slice %9 {offsets = [1, 0], sizes = [1, 32], strides = [1, 1]} : vector<8x256xf32> to vector<1x32xf32>
    %12 = vector.extract_strided_slice %9 {offsets = [2, 0], sizes = [1, 32], strides = [1, 1]} : vector<8x256xf32> to vector<1x32xf32>
    %13 = vector.extract_strided_slice %9 {offsets = [3, 0], sizes = [1, 128], strides = [1, 1]} : vector<8x256xf32> to vector<1x128xf32>
    %cst = arith.constant dense<0.000000e+00> : vector<64x96xf32>
    %14 = tpu.matmul %0, %1, %cst {dimension_numbers = #tpu.dot_dimension_numbers<[1], [0], [0], [1], [0, 0, 1, 1], [], []>} : vector<64x96xf32>, vector<96x96xf32>, vector<64x96xf32> -> vector<64x96xf32>
    %15 = arith.addf %14, %2 : vector<64x96xf32>
    %16 = vector.extract_strided_slice %15 {offsets = [0, 0], sizes = [64, 32], strides = [1, 1]} : vector<64x96xf32> to vector<64x32xf32>
    %17 = vector.extract_strided_slice %15 {offsets = [0, 32], sizes = [64, 64], strides = [1, 1]} : vector<64x96xf32> to vector<64x64xf32>
    %cst_11 = arith.constant dense<0.000000e+00> : vector<256x64xf32>
    %18 = tpu.matmul %3, %17, %cst_11 {dimension_numbers = #tpu.dot_dimension_numbers<[1], [0], [0], [1], [0, 0, 1, 1], [], []>} : vector<256x64xf32>, vector<64x64xf32>, vector<256x64xf32> -> vector<256x64xf32>
    %19 = arith.mulf %18, %4 : vector<256x64xf32>
    %20 = vector.extract_strided_slice %19 {offsets = [0, 0], sizes = [256, 32], strides = [1, 1]} : vector<256x64xf32> to vector<256x32xf32>
    %21 = vector.extract_strided_slice %19 {offsets = [0, 32], sizes = [256, 32], strides = [1, 1]} : vector<256x64xf32> to vector<256x32xf32>
    %cst_12 = arith.constant dense<0.000000e+00> : vector<64x256xf32>
    %22 = tpu.matmul %16, %20, %cst_12 {dimension_numbers = #tpu.dot_dimension_numbers<[1], [1], [0], [0], [0, 0, 1, 0], [], []>} : vector<64x32xf32>, vector<256x32xf32>, vector<64x256xf32> -> vector<64x256xf32>
    %cst_13 = arith.constant dense<0xFF800000> : vector<64xf32>
    %23 = vector.multi_reduction <maximumf>, %22, %cst_13 [1] : vector<64x256xf32> to vector<64xf32>
    %24 = vector.shape_cast %23 : vector<64xf32> to vector<64x1xf32>
    %25 = vector.broadcast %24 : vector<64x1xf32> to vector<64x256xf32>
    %26 = arith.subf %22, %25 : vector<64x256xf32>
    %27 = math.exp %26 : vector<64x256xf32>
    %cst_14 = arith.constant dense<0.000000e+00> : vector<64x256xf32>
    %28 = tpu.matmul %27, %5, %cst_14 {dimension_numbers = #tpu.dot_dimension_numbers<[1], [0], [0], [1], [0, 0, 1, 1], [], []>} : vector<64x256xf32>, vector<256x256xf32>, vector<64x256xf32> -> vector<64x256xf32>
    %29 = arith.divf %27, %28 : vector<64x256xf32>
    %30 = arith.mulf %29, %6 : vector<64x256xf32>
    %cst_15 = arith.constant dense<0.000000e+00> : vector<64x32xf32>
    %31 = tpu.matmul %30, %21, %cst_15 {dimension_numbers = #tpu.dot_dimension_numbers<[1], [0], [0], [1], [0, 0, 1, 1], [], []>} : vector<64x256xf32>, vector<256x32xf32>, vector<64x32xf32> -> vector<64x32xf32>
    %cst_16 = arith.constant dense<0.000000e+00> : vector<64x64xf32>
    %32 = tpu.matmul %31, %7, %cst_16 {dimension_numbers = #tpu.dot_dimension_numbers<[1], [0], [0], [1], [0, 0, 1, 1], [], []>} : vector<64x32xf32>, vector<32x64xf32>, vector<64x64xf32> -> vector<64x64xf32>
    %33 = vector.broadcast %10 : vector<1x64xf32> to vector<64x64xf32>
    %34 = arith.addf %32, %33 : vector<64x64xf32>
    %35 = vector.extract_strided_slice %34 {offsets = [0, 0], sizes = [64, 32], strides = [1, 1]} : vector<64x64xf32> to vector<64x32xf32>
    %36 = vector.extract_strided_slice %34 {offsets = [0, 32], sizes = [64, 32], strides = [1, 1]} : vector<64x64xf32> to vector<64x32xf32>
    %cst_17 = arith.constant 0.000000e+00 : f32
    %37 = vector.broadcast %cst_17 : f32 to vector<64x32xf32>
    %38 = arith.maximumf %36, %37 : vector<64x32xf32>
    %cst_18 = arith.constant dense<0.000000e+00> : vector<64xf32>
    %39 = vector.multi_reduction <add>, %35, %cst_18 [1] : vector<64x32xf32> to vector<64xf32>
    %40 = vector.shape_cast %39 : vector<64xf32> to vector<64x1xf32>
    %cst_19 = arith.constant 3.200000e+01 : f32
    %41 = vector.broadcast %cst_19 : f32 to vector<64x1xf32>
    %42 = arith.divf %40, %41 : vector<64x1xf32>
    %43 = vector.broadcast %42 : vector<64x1xf32> to vector<64x32xf32>
    %44 = arith.subf %35, %43 : vector<64x32xf32>
    %45 = arith.mulf %44, %44 : vector<64x32xf32>
    %cst_20 = arith.constant dense<0.000000e+00> : vector<64xf32>
    %46 = vector.multi_reduction <add>, %45, %cst_20 [1] : vector<64x32xf32> to vector<64xf32>
    %47 = vector.shape_cast %46 : vector<64xf32> to vector<64x1xf32>
    %cst_21 = arith.constant 3.200000e+01 : f32
    %48 = vector.broadcast %cst_21 : f32 to vector<64x1xf32>
    %49 = arith.divf %47, %48 : vector<64x1xf32>
    %50 = vector.broadcast %42 : vector<64x1xf32> to vector<64x32xf32>
    %51 = arith.subf %35, %50 : vector<64x32xf32>
    %cst_22 = arith.constant 9.99999974E-6 : f32
    %52 = vector.broadcast %cst_22 : f32 to vector<64x1xf32>
    %53 = arith.addf %49, %52 : vector<64x1xf32>
    %54 = math.rsqrt %53 : vector<64x1xf32>
    %55 = vector.broadcast %54 : vector<64x1xf32> to vector<64x32xf32>
    %56 = arith.mulf %51, %55 : vector<64x32xf32>
    %57 = vector.broadcast %11 : vector<1x32xf32> to vector<64x32xf32>
    %58 = arith.mulf %56, %57 : vector<64x32xf32>
    %59 = vector.broadcast %12 : vector<1x32xf32> to vector<64x32xf32>
    %60 = arith.addf %58, %59 : vector<64x32xf32>
    %61 = arith.addf %38, %60 : vector<64x32xf32>
    %cst_23 = arith.constant dense<0.000000e+00> : vector<64xf32>
    %62 = vector.multi_reduction <add>, %61, %cst_23 [1] : vector<64x32xf32> to vector<64xf32>
    %63 = vector.shape_cast %62 : vector<64xf32> to vector<64x1xf32>
    %cst_24 = arith.constant 3.200000e+01 : f32
    %64 = vector.broadcast %cst_24 : f32 to vector<64x1xf32>
    %65 = arith.divf %63, %64 : vector<64x1xf32>
    %66 = vector.broadcast %65 : vector<64x1xf32> to vector<64x32xf32>
    %67 = arith.subf %61, %66 : vector<64x32xf32>
    %68 = arith.mulf %67, %67 : vector<64x32xf32>
    %cst_25 = arith.constant dense<0.000000e+00> : vector<64xf32>
    %69 = vector.multi_reduction <add>, %68, %cst_25 [1] : vector<64x32xf32> to vector<64xf32>
    %70 = vector.shape_cast %69 : vector<64xf32> to vector<64x1xf32>
    %cst_26 = arith.constant 3.200000e+01 : f32
    %71 = vector.broadcast %cst_26 : f32 to vector<64x1xf32>
    %72 = arith.divf %70, %71 : vector<64x1xf32>
    %73 = vector.broadcast %65 : vector<64x1xf32> to vector<64x32xf32>
    %74 = arith.subf %61, %73 : vector<64x32xf32>
    %cst_27 = arith.constant 9.99999974E-6 : f32
    %75 = vector.broadcast %cst_27 : f32 to vector<64x1xf32>
    %76 = arith.addf %72, %75 : vector<64x1xf32>
    %77 = math.rsqrt %76 : vector<64x1xf32>
    %78 = vector.broadcast %77 : vector<64x1xf32> to vector<64x32xf32>
    %79 = arith.mulf %74, %78 : vector<64x32xf32>
    %80 = vector.broadcast %11 : vector<1x32xf32> to vector<64x32xf32>
    %81 = arith.mulf %79, %80 : vector<64x32xf32>
    %82 = vector.broadcast %12 : vector<1x32xf32> to vector<64x32xf32>
    %83 = arith.addf %81, %82 : vector<64x32xf32>
    %cst_28 = arith.constant dense<0.000000e+00> : vector<64x128xf32>
    %84 = tpu.matmul %83, %8, %cst_28 {dimension_numbers = #tpu.dot_dimension_numbers<[1], [0], [0], [1], [0, 0, 1, 1], [], []>} : vector<64x32xf32>, vector<32x128xf32>, vector<64x128xf32> -> vector<64x128xf32>
    %85 = vector.broadcast %13 : vector<1x128xf32> to vector<64x128xf32>
    %86 = arith.addf %84, %85 : vector<64x128xf32>
    %c0_29 = arith.constant 0 : index
    %c0_30 = arith.constant 0 : index
    %87 = vector.load %arg3[%c0_29, %c0_30] : memref<64x128xf32, #tpu.memory_space<vmem>>, vector<64x128xf32>
    tpu.vector_store %arg3[%c0_29, %c0_30], %86 {strides = array<i32>} : memref<64x128xf32, #tpu.memory_space<vmem>>, vector<64x128xf32>,
    return
  }
  func.func @transform_0(%arg0: i32) -> (i32, i32) {
    %c0_i32 = arith.constant 0 : i32
    %c0_i32_0 = arith.constant 0 : i32
    return %arg0, %c0_i32 : i32, i32
  }
  func.func @transform_1(%arg0: i32) -> (i32, i32) {
    %c0_i32 = arith.constant 0 : i32
    %c0_i32_0 = arith.constant 0 : i32
    %c0_i32_1 = arith.constant 0 : i32
    return %c0_i32, %c0_i32_0 : i32, i32
  }
  func.func @transform_2(%arg0: i32) -> (i32, i32) {
    %c0_i32 = arith.constant 0 : i32
    %c0_i32_0 = arith.constant 0 : i32
    return %arg0, %c0_i32 : i32, i32
  }
}

</mosaic_0001>

<bundles_post_ra>
// kernel: saokt_forward.1
= control target key start
LH: loop header
LB: loop body
LE: loop exit
PB: predicated region body
PF: predicated region fallthrough
CT: control target
= control target key end

     0   :  { %7 = vsyncpa [#allocation3], 0  ;;  %s4558_s0 = inlined_call_operand.vmem [shape: f32[128,96], index: 0, kind: input, shape index: {}]   ;;  %s4559_s1 = inlined_call_operand.vmem [shape: f32[1064,256], index: 1, kind: input, shape index: {}]   ;;  %s4560_s2 = inlined_call_operand.hbm [shape: f32[128,128], index: 2, kind: output, shape index: {}]  }
   0x1   :  { %9 = vsyncpa [#allocation3 + $0x1], 0  ;;  %s3201_s9 = smov 0   ;;  %s3203_s10 = smov 0  }
   0x2   :  { %s3205_s11 = smov 0   ;;  %s3207_s12 = smov 0  }
   0x3 LB: > { %s3222_s13 = sadd.s32 4294967295, %s3179_s12   ;;  %s2237_s14 = sadd.s32 4294967294, %s3179_s12   ;;  %s3179_s12 = sphi %s3207_s12, %s4576_s12   ;;  %s3175_s11 = sphi %s3205_s11, %s4575_s11   ;;  %s3171_s10 = sphi %s3203_s10, %s4574_s10   ;;  %s3167_s9 = sphi %s3201_s9, %s4573_s9  }
   0x4   : > { %s3226_s15 = sadd.s32 1, %s3179_s12   ;;  %s69_s16 = sadd.s32 1, %s3175_s11 }
   0x5   : > { %s66_s17 = ssub.s32 %s3179_s12, %s3226_s15  ;;  %p79_p0 = scmp.ne.s32.totalorder %s3175_s11, %s3171_s10 }
   0x6   : > { %p67_p1 = scmp.eq.s32.totalorder %s66_s17, 0  ;;  %p80_p2 = scmp.eq.s32.totalorder %s3222_s13, 1 }
   0x7   : > { %p85_p3 = scmp.ne.s32.totalorder %s3171_s10, %s3167_s9  ;;  %p86_p4 = scmp.eq.s32.totalorder %s2237_s14, 1 }
   0x8   : > { %s3237_s18 = scalar_select %p67_p1, %s3175_s11, %s69_s16  }
   0x9   : > { %p3239_p5 = por %p80_p2, %p79_p0  ;;  %p3243_p6 = por %p86_p4, %p85_p3 }
   0xa   : > { %p2240_p7 = scmp.ge.s32.totalorder %s3179_s12, 1  ;;  %p116_p8 = scmp.lt.s32.totalorder %s3179_s12, 3 }
   0xc   : > { %p117_p9 = pnand %p2240_p7, %p116_p8 }
   0xd   : > { %v153_v0 = vld [vmem:[%s4559_s1] sm:$0xff] (!%p117_p9)  ;;  %v154_v1 = vld [vmem:[%s4559_s1 + $0x10] sm:$0xff] (!%p117_p9)  ;;  %s2242_s27 = sshll.u32 (!%p117_p9), %s3222_s13, 3  ;;  %vm326_vm0 = vcmask (!%p117_p9), 785408   ;;  %s3181_s17 = smov (!%p117_p9), 96   ;;  %vm488_vm1 = vcmask (!%p117_p9), 523264  }
   0xe   : > { %120 = sbr.rel (%p117_p9) target bundleno = 3088 (0xc10), region = 28  ;;  %v155_v2 = vld [vmem:[%s4559_s1 + $0x20] sm:$0xff] (!%p117_p9)  ;;  %v2674_v3 = vpack.c.bf16 (!%p117_p9), %v154_v1, %v153_v0  ;;  %v156_v4 = vld [vmem:[%s4559_s1 + $0x30] sm:$0xff] (!%p117_p9)  ;;  %p139_p10 = scmp.lt.s32.totalorder (!%p117_p9), %s2242_s27, 15  ;;  %vm842_vm2 = vcmask (!%p117_p9), 261120  }
   0xf   : > { %v2678_v5 = vpack.c.bf16 (!%p117_p9), %v156_v4, %v155_v2  ;;  %v157_v6 = vld [vmem:[%s4559_s1 + $0x40] sm:$0xff] (!%p117_p9)  ;;  %v158_v7 = vld [vmem:[%s4559_s1 + $0x50] sm:$0xff] (!%p117_p9)  ;;  %vm3616_vm3 = vmpackc.low (!%p117_p9), %vm842_vm2, %vm842_vm2  ;;  %s3182_s21 = smov (!%p117_p9), 32   ;;  %s2345_s4 = sshll.u32 (!%p117_p9), %s3222_s13, 10 }
  0x10   : > { %2675 = vmatprep.subr.bf16.mxu0 (!%p117_p9), %v2674_v3  ;;  %v2682_v8 = vpack.c.bf16 (!%p117_p9), %v158_v7, %v157_v6  ;;  %v159_v9 = vld [vmem:[%s4559_s1 + $0x60] sm:$0xff] (!%p117_p9)  ;;  %v160_v10 = vld [vmem:[%s4559_s1 + $0x70] sm:$0xff] (!%p117_p9)  ;;  %s4511_s8 = scalar_lea.hbm (!%p117_p9), %s4560_s2, %s2345_s4  ;;  %s3183_s16 = smov (!%p117_p9), [#allocation2]  }
  0x11   : > { %2677 = vmatpush3.bf16.msra.mxu0 (!%p117_p9), %v2674_v3  ;;  %v2686_v12 = vpack.c.bf16 (!%p117_p9), %v160_v10, %v159_v9  ;;  %v161_v13 = vld [vmem:[%s4559_s1 + $0x80] sm:$0xff] (!%p117_p9)  ;;  %v162_v14 = vld [vmem:[%s4559_s1 + $0x90] sm:$0xff] (!%p117_p9) }
  0x12   : > { %2679 = vmatprep.subr.bf16.mxu0 (!%p117_p9), %v2678_v5  ;;  %v2690_v15 = vpack.c.bf16 (!%p117_p9), %v162_v14, %v161_v13  ;;  %v163_v16 = vld [vmem:[%s4559_s1 + $0xa0] sm:$0xff] (!%p117_p9)  ;;  %v164_v17 = vld [vmem:[%s4559_s1 + $0xb0] sm:$0xff] (!%p117_p9) }
  0x13   : > { %v2694_v18 = vpack.c.bf16 (!%p117_p9), %v164_v17, %v163_v16  ;;  %v166_v26 = vld [vmem:[%s4559_s1 + $0xd0] sm:$0xff] (!%p117_p9)  ;;  %v165_v27 = vld [vmem:[%s4559_s1 + $0xc0] sm:$0xff] (!%p117_p9) }
  0x14   : > { %v168_v32 = vld [vmem:[%s4559_s1 + $0xf0] sm:$0xff] (!%p117_p9)  ;;  %v167_v33 = vld [vmem:[%s4559_s1 + $0xe0] sm:$0xff] (!%p117_p9) }
  0x15   : > { %s4578_s27 = smov (!%p139_p10, %s2242_s27), 15  ;;  %2681 = vmatpush3.bf16.msra.mxu0 %v2678_v5  ;;  %v170_v39 = vld [vmem:[%s4559_s1 + $0x110] sm:$0xff]  ;;  %v169_v40 = vld [vmem:[%s4559_s1 + $0x100] sm:$0xff] }
  0x16   : > { %s2243_s6 = sshll.u32 %s4578_s27, 3  ;;  %2683 = vmatprep.subr.bf16.mxu0 %v2682_v8  ;;  %v172_v46 = vld [vmem:[%s4559_s1 + $0x130] sm:$0xff]  ;;  %v173_v47 = vld [vmem:[%s4559_s1 + $0x140] sm:$0xff] }
  0x17   : > { %s3277_s22 = scalar_lea.vmem %s4558_s0, %s2243_s6  ;;  %v171_v48 = vld [vmem:[%s4559_s1 + $0x120] sm:$0xff]  ;;  %2586 = vmatprep.mubr.msk.f32.mxu1 %vm488_vm1, %v173_v47  ;;  %v174_v7 = vld [vmem:[%s4559_s1 + $0x150] sm:$0xff] }
  0x18   : > { %v145_v11 = vld [vmem:[%s3277_s22] sm:$0xff]  ;;  %v146_v19 = vld [vmem:[%s3277_s22 + $0x8] sm:$0xff]  ;;  %v147_v20 = vld [vmem:[%s3277_s22 + $0x10] sm:$0xff] }
  0x19   : > { %2558 = vmatprep.mubr.msk.f32.mxu0 %vm326_vm0, %v145_v11  ;;  %2685 = vmatpush3.bf16.msra.mxu0 %v2682_v8  ;;  %v148_v21 = vld [vmem:[%s3277_s22 + $0x18] sm:$0xff]  ;;  %v149_v22 = vld [vmem:[%s3277_s22 + $0x20] sm:$0xff]  ;;  %v150_v23 = vld [vmem:[%s3277_s22 + $0x28] sm:$0xff] }
  0x1a   : > { %2687 = vmatprep.subr.bf16.mxu0 %v2686_v12  ;;  %v151_v24 = vld [vmem:[%s3277_s22 + $0x30] sm:$0xff]  ;;  %v152_v25 = vld [vmem:[%s3277_s22 + $0x38] sm:$0xff]  ;;  %v175_v8 = vld [vmem:[%s4559_s1 + $0x160] sm:$0xff] }
  0x1b   : > { %v176_v9 = vld [vmem:[%s4559_s1 + $0x170] sm:$0xff]  ;;  %v177_v10 = vld [vmem:[%s4559_s1 + $0x180] sm:$0xff] }
  0x1c   : > { %v178_v11 = vld [vmem:[%s4559_s1 + $0x190] sm:$0xff]  ;;  %v181_v14 = vld [vmem:[%s4559_s1 + $0x1c0] sm:$0xff] }
  0x1d   : > { %2689 = vmatpush3.bf16.msra.mxu0 %v2686_v12  ;;  %v179_v12 = vld [vmem:[%s4559_s1 + $0x1a0] sm:$0xff]  ;;  %v180_v13 = vld [vmem:[%s4559_s1 + $0x1b0] sm:$0xff] }
  0x1e   : > { %2691 = vmatprep.subr.bf16.mxu0 %v2690_v15  ;;  %v183_v16 = vld [vmem:[%s4559_s1 + $0x1e0] sm:$0xff]  ;;  %v184_v17 = vld [vmem:[%s4559_s1 + $0x1f0] sm:$0xff] }
  0x21   : > { %2693 = vmatpush3.bf16.msra.mxu0 %v2690_v15  ;;  %v182_v15 = vld [vmem:[%s4559_s1 + $0x1d0] sm:$0xff] }
  0x22   : > { %2695 = vmatprep.subr.bf16.mxu0 %v2694_v18 }
  0x25   : > { %2697 = vmatpush3.bf16.msra.mxu0 %v2694_v18  ;;  %v185_v18 = vld [vmem:[%s4559_s1 + $0x200] sm:$0xff] }
  0x28   : > { %2559 = vmatmul.mubr.msk.f32.vlgmr.msra.gmra.mrb[0].mxu0 %vm326_vm0, %v146_v19  ;;  %v186_v19 = vld [vmem:[%s4559_s1 + $0x210] sm:$0xff] }
  0x29   : > { %2561 = vmatprep.mubr.msk.f32.mxu0 %vm326_vm0, %v147_v20  ;;  %v187_v20 = vld [vmem:[%s4559_s1 + $0x220] sm:$0xff] }
  0x2c   : > { %2562 = vmatmul.mubr.msk.f32.gmra.mrb[2].mxu0 %vm326_vm0, %v148_v21  ;;  %v188_v21 = vld [vmem:[%s4559_s1 + $0x230] sm:$0xff] }
  0x2d   : > { %2564 = vmatprep.mubr.msk.f32.mxu0 %vm326_vm0, %v149_v22  ;;  %v189_v22 = vld [vmem:[%s4559_s1 + $0x240] sm:$0xff] }
  0x30   : > { %2565 = vmatmul.mubr.msk.f32.gmra.mrb[4].mxu0 %vm326_vm0, %v150_v23  ;;  %v190_v23 = vld [vmem:[%s4559_s1 + $0x250] sm:$0xff] }
  0x31   : > { %2567 = vmatprep.mubr.msk.f32.mxu0 %vm326_vm0, %v151_v24  ;;  %v191_v24 = vld [vmem:[%s4559_s1 + $0x260] sm:$0xff] }
  0x34   : > { %2568 = vmatmul.mubr.msk.f32.gmra.mrb[6].mxu0 %vm326_vm0, %v152_v25  ;;  %v192_v25 = vld [vmem:[%s4559_s1 + $0x270] sm:$0xff] }
  0xfb   : > { %v2560_v28 = vpop.f32.mrb[0].mxu0 }
  0xfc   : > { %v3313_v29 = vadd.f32 %v2560_v28, %v166_v26  ;;  %v417_v30 = vpop.f32.mrb[1].mxu0  ;;  %v193_v26 = vld [vmem:[%s4559_s1 + $0x280] sm:$0xff] }
  0xfd   : > { %v3315_v31 = vadd.f32 %v417_v30, %v165_v27  ;;  %v194_v27 = vld [vmem:[%s4559_s1 + $0x290] sm:$0xff]  ;;  %v195_v28 = vld [vmem:[%s4559_s1 + $0x2a0] sm:$0xff] }
  0xfe   : > { %v196_v30 = vld [vmem:[%s4559_s1 + $0x2b0] sm:$0xff] }
  0xff   : > { %v2563_v34 = vpop.f32.mrb[2].mxu0  ;;  %v2921_v35 = vpack.i.bf16 %v3313_v29, %v3315_v31 }
 0x100   : > { %v3325_v36 = vadd.f32 %v2563_v34, %v168_v32  ;;  %v427_v37 = vpop.f32.mrb[3].mxu0  ;;  %v197_v32 = vld [vmem:[%s4559_s1 + $0x2c0] sm:$0xff] }
 0x101   : > { %v3327_v38 = vadd.f32 %v427_v37, %v167_v33  ;;  %2922 = vrot.lane.b32.xlu0 %v2921_v35, %s3181_s17  ;;  %v198_v33 = vld [vmem:[%s4559_s1 + $0x2d0] sm:$0xff]  ;;  %v199_v34 = vld [vmem:[%s4559_s1 + $0x2e0] sm:$0xff] }
 0x102   : > { %v200_v35 = vld [vmem:[%s4559_s1 + $0x2f0] sm:$0xff]  ;;  %v201_v37 = vld [vmem:[%s4559_s1 + $0x300] sm:$0xff] }
 0x103   : > { %v2566_v41 = vpop.f32.mrb[4].mxu0  ;;  %v2926_v42 = vpack.i.bf16 %v3325_v36, %v3327_v38 }
 0x104   : > { %v3338_v43 = vadd.f32 %v2566_v41, %v170_v39  ;;  %v437_v44 = vpop.f32.mrb[5].mxu0  ;;  %v202_v39 = vld [vmem:[%s4559_s1 + $0x310] sm:$0xff] }
 0x105   : > { %v3340_v45 = vadd.f32 %v437_v44, %v169_v40  ;;  %2927 = vrot.lane.b32.xlu0 %v2926_v42, %s3181_s17  ;;  %v203_v40 = vld [vmem:[%s4559_s1 + $0x320] sm:$0xff]  ;;  %v204_v41 = vld [vmem:[%s4559_s1 + $0x330] sm:$0xff] }
 0x106   : > { %v206_v42 = vld [vmem:[%s4559_s1 + $0x350] sm:$0xff]  ;;  %v205_v44 = vld [vmem:[%s4559_s1 + $0x340] sm:$0xff] }
 0x107   : > { %v2569_v49 = vpop.f32.mrb[6].mxu0  ;;  %v2931_v50 = vpack.i.bf16 %v3338_v43, %v3340_v45 }
 0x108   : > { %v3355_v51 = vadd.f32 %v2569_v49, %v172_v46  ;;  %v447_v52 = vpop.f32.mrb[7].mxu0 }
 0x109   : > { %v3357_v53 = vadd.f32 %v447_v52, %v171_v48  ;;  %2932 = vrot.lane.b32.xlu1 %v2931_v50, %s3181_s17  ;;  %v208_v50 = vld [vmem:[%s4559_s1 + $0x370] sm:$0xff]  ;;  %v207_v52 = vld [vmem:[%s4559_s1 + $0x360] sm:$0xff] }
 0x10b   : > { %v2936_v54 = vpack.i.bf16 %v3355_v51, %v3357_v53 }
 0x10d   : > { %2937 = vrot.lane.b32.xlu1 %v2936_v54, %s3181_s17 }
 0x173   : > { %v2923_v55 = vpop.permute.xlu0 %2922 }
 0x174   : > { %v2925_v56 = vunpack.i.h.bf16 %v2923_v55  ;;  %v2924_v57 = vunpack.i.l.bf16 %v2923_v55 }
 0x176   : > { %v2698_v58 = vpack.c.bf16 %v2925_v56, %v2924_v57 }
 0x177   : > { %v2928_v59 = vpop.permute.xlu0 %2927 }
 0x178   : > { %v2930_v60 = vunpack.i.h.bf16 %v2928_v59  ;;  %v2929_v61 = vunpack.i.l.bf16 %v2928_v59  ;;  %2699 = vmatprep.subr.bf16.mxu1 %v2698_v58 }
 0x179   : > { %2701 = vmatpush3.bf16.msra.mxu1 %v2698_v58 }
 0x17a   : > { %v2702_v62 = vpack.c.bf16 %v2930_v60, %v2929_v61  ;;  %v210_v60 = vld [vmem:[%s4559_s1 + $0x390] sm:$0xff]  ;;  %v209_v61 = vld [vmem:[%s4559_s1 + $0x380] sm:$0xff] }
 0x17b   : > { %v2933_v63 = vpop.permute.xlu1 %2932 }
 0x17c   : > { %v2935_v0 = vunpack.i.h.bf16 %v2933_v63  ;;  %v2934_v1 = vunpack.i.l.bf16 %v2933_v63  ;;  %2703 = vmatprep.subr.bf16.mxu1 %v2702_v62 }
 0x17d   : > { %2705 = vmatpush3.bf16.msra.mxu1 %v2702_v62 }
 0x17e   : > { %v2706_v2 = vpack.c.bf16 %v2935_v0, %v2934_v1 }
 0x17f   : > { %v2938_v3 = vpop.permute.xlu1 %2937 }
 0x180   : > { %v2940_v4 = vunpack.i.h.bf16 %v2938_v3  ;;  %v2939_v5 = vunpack.i.l.bf16 %v2938_v3  ;;  %2707 = vmatprep.subr.bf16.mxu1 %v2706_v2 }
 0x181   : > { %2709 = vmatpush3.bf16.msra.mxu1 %v2706_v2 }
 0x182   : > { %v2710_v6 = vpack.c.bf16 %v2940_v4, %v2939_v5  ;;  %v212_v4 = vld [vmem:[%s4559_s1 + $0x3b0] sm:$0xff]  ;;  %v211_v5 = vld [vmem:[%s4559_s1 + $0x3a0] sm:$0xff] }
 0x184   : > { %2711 = vmatprep.subr.bf16.mxu1 %v2710_v6 }
 0x185   : > { %2713 = vmatpush3.bf16.msra.mxu1 %v2710_v6 }
 0x188   : > { %2587 = vmatmul.mubr.msk.f32.vlgmr.msra.gmra.mrb[0].mxu1 %vm488_vm1, %v174_v7 }
 0x189   : > { %2589 = vmatprep.mubr.msk.f32.mxu1 %vm488_vm1, %v175_v8 }
 0x18c   : > { %2590 = vmatmul.mubr.msk.f32.gmra.mrb[2].mxu1 %vm488_vm1, %v176_v9 }
 0x18d   : > { %2592 = vmatprep.mubr.msk.f32.mxu1 %vm488_vm1, %v177_v10 }
 0x190   : > { %2593 = vmatmul.mubr.msk.f32.gmra.mrb[4].mxu1 %vm488_vm1, %v178_v11 }
 0x191   : > { %2595 = vmatprep.mubr.msk.f32.mxu1 %vm488_vm1, %v179_v12  ;;  %v214_v12 = vld [vmem:[%s4559_s1 + $0x3d0] sm:$0xff] }
 0x194   : > { %2596 = vmatmul.mubr.msk.f32.gmra.mrb[6].mxu1 %vm488_vm1, %v180_v13  ;;  %v213_v13 = vld [vmem:[%s4559_s1 + $0x3c0] sm:$0xff] }
 0x195   : > { %2598 = vmatprep.mubr.msk.f32.mxu1 %vm488_vm1, %v181_v14 }
 0x198   : > { %2599 = vmatmul.mubr.msk.f32.gmra.mrb[8].mxu1 %vm488_vm1, %v182_v15 }
 0x199   : > { %2601 = vmatprep.mubr.msk.f32.mxu1 %vm488_vm1, %v183_v16 }
 0x19c   : > { %2602 = vmatmul.mubr.msk.f32.gmra.mrb[10].mxu1 %vm488_vm1, %v184_v17 }
 0x19d   : > { %2604 = vmatprep.mubr.msk.f32.mxu1 %vm488_vm1, %v185_v18 }
 0x1a0   : > { %2605 = vmatmul.mubr.msk.f32.gmra.mrb[12].mxu1 %vm488_vm1, %v186_v19 }
 0x1a1   : > { %2607 = vmatprep.mubr.msk.f32.mxu1 %vm488_vm1, %v187_v20  ;;  %v216_v20 = vld [vmem:[%s4559_s1 + $0x3f0] sm:$0xff] }
 0x1a4   : > { %2608 = vmatmul.mubr.msk.f32.gmra.mrb[14].mxu1 %vm488_vm1, %v188_v21  ;;  %v215_v21 = vld [vmem:[%s4559_s1 + $0x3e0] sm:$0xff] }
 0x1a5   : > { %2610 = vmatprep.mubr.msk.f32.mxu1 %vm488_vm1, %v189_v22 }
 0x1a8   : > { %2611 = vmatmul.mubr.msk.f32.gmra.mrb[16].mxu1 %vm488_vm1, %v190_v23 }
 0x1a9   : > { %2613 = vmatprep.mubr.msk.f32.mxu1 %vm488_vm1, %v191_v24 }
 0x1ac   : > { %2614 = vmatmul.mubr.msk.f32.gmra.mrb[18].mxu1 %vm488_vm1, %v192_v25 }
 0x1ad   : > { %2616 = vmatprep.mubr.msk.f32.mxu1 %vm488_vm1, %v193_v26 }
 0x1b0   : > { %2617 = vmatmul.mubr.msk.f32.gmra.mrb[20].mxu1 %vm488_vm1, %v194_v27 }
 0x1b1   : > { %2619 = vmatprep.mubr.msk.f32.mxu1 %vm488_vm1, %v195_v28  ;;  %v218_v28 = vld [vmem:[%s4559_s1 + $0x410] sm:$0xff] }
 0x1b4   : > { %2620 = vmatmul.mubr.msk.f32.gmra.mrb[22].mxu1 %vm488_vm1, %v196_v30  ;;  %v217_v30 = vld [vmem:[%s4559_s1 + $0x400] sm:$0xff] }
 0x1b5   : > { %2622 = vmatprep.mubr.msk.f32.mxu1 %vm488_vm1, %v197_v32 }
 0x1b8   : > { %2623 = vmatmul.mubr.msk.f32.gmra.mrb[24].mxu1 %vm488_vm1, %v198_v33 }
 0x1b9   : > { %2625 = vmatprep.mubr.msk.f32.mxu1 %vm488_vm1, %v199_v34 }
 0x1bc   : > { %2626 = vmatmul.mubr.msk.f32.gmra.mrb[26].mxu1 %vm488_vm1, %v200_v35 }
 0x1bd   : > { %2628 = vmatprep.mubr.msk.f32.mxu1 %vm488_vm1, %v201_v37 }
 0x1c0   : > { %2629 = vmatmul.mubr.msk.f32.gmra.mrb[28].mxu1 %vm488_vm1, %v202_v39 }
 0x1c1   : > { %2631 = vmatprep.mubr.msk.f32.mxu1 %vm488_vm1, %v203_v40  ;;  %v220_v40 = vld [vmem:[%s4559_s1 + $0x430] sm:$0xff] }
 0x1c4   : > { %2632 = vmatmul.mubr.msk.f32.gmra.mrb[30].mxu1 %vm488_vm1, %v204_v41  ;;  %v219_v41 = vld [vmem:[%s4559_s1 + $0x420] sm:$0xff] }
 0x1c5   : > { %2438 = vmatprep.mubr.msk.f32.mxu1 %vm842_vm2, %v3315_v31 }
 0x25b   : > { %v2588_v46 = vpop.f32.mrb[0].mxu1 }
 0x25c   : > { %v3495_v47 = vmul.f32 %v2588_v46, %v206_v42  ;;  %v651_v48 = vpop.f32.mrb[1].mxu1 }
 0x25d   : > { %v3497_v49 = vmul.f32 %v651_v48, %v205_v44 }
 0x25f   : > { %v2946_v54 = vpack.i.bf16 %v3495_v47, %v3497_v49  ;;  %v2717_v55 = vpack.c.bf16 %v3495_v47, %v3497_v49  ;;  %v2591_v56 = vpop.f32.mrb[2].mxu1 }
 0x260   : > { %v3509_v57 = vmul.f32 %v2591_v56, %v208_v50  ;;  %v661_v58 = vpop.f32.mrb[3].mxu1  ;;  %v222_v56 = vld [vmem:[%s4559_s1 + $0x450] sm:$0xff] }
 0x261   : > { %v3511_v59 = vmul.f32 %v661_v58, %v207_v52  ;;  %v221_v58 = vld [vmem:[%s4559_s1 + $0x440] sm:$0xff] }
 0x263   : > { %v2956_v62 = vpack.i.bf16 %v3509_v57, %v3511_v59  ;;  %v2723_v63 = vpack.c.bf16 %v3509_v57, %v3511_v59  ;;  %v2594_v0 = vpop.f32.mrb[4].mxu1 }
 0x264   : > { %v3523_v1 = vmul.f32 %v2594_v0, %v210_v60  ;;  %v671_v2 = vpop.f32.mrb[5].mxu1 }
 0x265   : > { %v3525_v3 = vmul.f32 %v671_v2, %v209_v61 }
 0x267   : > { %v2966_v6 = vpack.i.bf16 %v3523_v1, %v3525_v3  ;;  %v2729_v7 = vpack.c.bf16 %v3523_v1, %v3525_v3  ;;  %v2597_v8 = vpop.f32.mrb[6].mxu1 }
 0x268   : > { %v3537_v9 = vmul.f32 %v2597_v8, %v212_v4  ;;  %v681_v10 = vpop.f32.mrb[7].mxu1  ;;  %v224_v8 = vld [vmem:[%s4559_s1 + $0x470] sm:$0xff] }
 0x269   : > { %v3539_v11 = vmul.f32 %v681_v10, %v211_v5 }
 0x26b   : > { %v2976_v14 = vpack.i.bf16 %v3537_v9, %v3539_v11  ;;  %v2735_v15 = vpack.c.bf16 %v3537_v9, %v3539_v11  ;;  %v2600_v16 = vpop.f32.mrb[8].mxu1 }
 0x26c   : > { %v3551_v17 = vmul.f32 %v2600_v16, %v214_v12  ;;  %v691_v18 = vpop.f32.mrb[9].mxu1  ;;  %v223_v12 = vld [vmem:[%s4559_s1 + $0x460] sm:$0xff] }
 0x26d   : > { %v3553_v19 = vmul.f32 %v691_v18, %v213_v13 }
 0x26f   : > { %v2741_v23 = vpack.c.bf16 %v3551_v17, %v3553_v19  ;;  %v2603_v24 = vpop.f32.mrb[10].mxu1  ;;  %v4565_v47 = vpack.i.bf16 %v3551_v17, %v3553_v19 }
 0x270   : > { %v3565_v25 = vmul.f32 %v2603_v24, %v216_v20  ;;  %v701_v26 = vpop.f32.mrb[11].mxu1 }
 0x271   : > { %v3567_v27 = vmul.f32 %v701_v26, %v215_v21  ;;  %v226_v26 = vld [vmem:[%s4559_s1 + $0x490] sm:$0xff] }
 0x273   : > { %v2747_v33 = vpack.c.bf16 %v3565_v25, %v3567_v27  ;;  %v2606_v34 = vpop.f32.mrb[12].mxu1 }
 0x274   : > { %v3579_v35 = vmul.f32 %v2606_v34, %v218_v28  ;;  %v711_v37 = vpop.f32.mrb[13].mxu1  ;;  %v225_v28 = vld [vmem:[%s4559_s1 + $0x480] sm:$0xff] }
 0x275   : > { %v3581_v39 = vmul.f32 %v711_v37, %v217_v30 }
 0x277   : > { %v2753_v44 = vpack.c.bf16 %v3579_v35, %v3581_v39  ;;  %v2609_v46 = vpop.f32.mrb[14].mxu1  ;;  %v4569_v59 = vpack.i.bf16 %v3579_v35, %v3581_v39 }
 0x278   : > { %v3593_v48 = vmul.f32 %v2609_v46, %v220_v40  ;;  %v721_v50 = vpop.f32.mrb[15].mxu1 }
 0x279   : > { %v3595_v52 = vmul.f32 %v721_v50, %v219_v41  ;;  %v227_v50 = vld [vmem:[%s4559_s1 + $0x4a0] sm:$0xff] }
 0x27b   : > { %v2759_v61 = vpack.c.bf16 %v3593_v48, %v3595_v52  ;;  %v2612_v0 = vpop.f32.mrb[16].mxu1  ;;  %v4571_v1 = vpack.i.bf16 %v3593_v48, %v3595_v52 }
 0x27c   : > { %v3607_v2 = vmul.f32 %v2612_v0, %v222_v56  ;;  %v731_v4 = vpop.f32.mrb[17].mxu1 }
 0x27d   : > { %v3609_v5 = vmul.f32 %v731_v4, %v221_v58 }
 0x27f   : > { %v2941_v13 = vpack.i.bf16 %v3607_v2, %v3609_v5  ;;  %v2714_v16 = vpack.c.bf16 %v3607_v2, %v3609_v5  ;;  %v2615_v18 = vpop.f32.mrb[18].mxu1 }
 0x280   : > { %v3627_v20 = vmul.f32 %v2615_v18, %v224_v8  ;;  %v741_v21 = vpop.f32.mrb[19].mxu1  ;;  %v229_v18 = vld [vmem:[%s4559_s1 + $0x4c0] sm:$0xff] }
 0x281   : > { %2716 = vmatprep.subr.msk.bf16.mxu1 %vm3616_vm3, %v2714_v16  ;;  %v3631_v24 = vmul.f32 %v741_v21, %v223_v12  ;;  %v230_v16 = vld [vmem:[%s4559_s1 + $0x4d0] sm:$0xff] }
 0x282   : > { %2719 = vmatpush3.bf16.xpose.msk.msra.mxu1 %vm3616_vm3, %v2717_v55  ;;  %v228_v55 = vld [vmem:[%s4559_s1 + $0x4b0] sm:$0xff] }
 0x283   : > { %v2951_v30 = vpack.i.bf16 %v3627_v20, %v3631_v24  ;;  %v2720_v34 = vpack.c.bf16 %v3627_v20, %v3631_v24  ;;  %v2618_v37 = vpop.f32.mrb[20].mxu1 }
 0x284   : > { %v3648_v40 = vmul.f32 %v2618_v37, %v226_v26  ;;  %v751_v41 = vpop.f32.mrb[21].mxu1 }
 0x285   : > { %2722 = vmatprep.subr.msk.bf16.mxu1 %vm3616_vm3, %v2720_v34  ;;  %v3652_v46 = vmul.f32 %v751_v41, %v225_v28 }
 0x287   : > { %v2961_v56 = vpack.i.bf16 %v3648_v40, %v3652_v46  ;;  %v2726_v58 = vpack.c.bf16 %v3648_v40, %v3652_v46  ;;  %v2621_v0 = vpop.f32.mrb[22].mxu1 }
 0x288   : > { %v3664_v4 = vmul.f32 %v2621_v0, %v228_v55  ;;  %v761_v8 = vpop.f32.mrb[23].mxu1  ;;  %v231_v55 = vld [vmem:[%s4559_s1 + $0x4e0] sm:$0xff] }
 0x289   : > { %v3666_v12 = vmul.f32 %v761_v8, %v227_v50 }
 0x28a   : > { %2725 = vmatpush3.bf16.xpose.msk.msra.mxu1 %vm3616_vm3, %v2723_v63  ;;  %v232_v63 = vld [vmem:[%s4559_s1 + $0x4f0] sm:$0xff] }
 0x28b   : > { %2728 = vmatprep.subr.msk.bf16.mxu1 %vm3616_vm3, %v2726_v58  ;;  %v2971_v21 = vpack.i.bf16 %v3664_v4, %v3666_v12  ;;  %v2732_v26 = vpack.c.bf16 %v3664_v4, %v3666_v12  ;;  %v2624_v28 = vpop.f32.mrb[24].mxu1 }
 0x28c   : > { %v3685_v34 = vmul.f32 %v2624_v28, %v230_v16  ;;  %v771_v37 = vpop.f32.mrb[25].mxu1  ;;  %v234_v28 = vld [vmem:[%s4559_s1 + $0x510] sm:$0xff] }
 0x28d   : > { %v3687_v41 = vmul.f32 %v771_v37, %v229_v18  ;;  %v233_v37 = vld [vmem:[%s4559_s1 + $0x500] sm:$0xff] }
 0x28f   : > { %v2738_v58 = vpack.c.bf16 %v3685_v34, %v3687_v41  ;;  %v2627_v0 = vpop.f32.mrb[26].mxu1  ;;  %v4566_v49 = vpack.i.bf16 %v3685_v34, %v3687_v41 }
 0x290   : > { %v3699_v8 = vmul.f32 %v2627_v0, %v232_v63  ;;  %v781_v16 = vpop.f32.mrb[27].mxu1 }
 0x291   : > { %v3701_v18 = vmul.f32 %v781_v16, %v231_v55 }
 0x292   : > { %2731 = vmatpush3.bf16.xpose.msk.msra.mxu1 %vm3616_vm3, %v2729_v7  ;;  %v236_v7 = vld [vmem:[%s4559_s1 + $0x530] sm:$0xff] }
 0x293   : > { %2734 = vmatprep.subr.msk.bf16.mxu1 %vm3616_vm3, %v2732_v26  ;;  %v2744_v55 = vpack.c.bf16 %v3699_v8, %v3701_v18  ;;  %v2630_v0 = vpop.f32.mrb[28].mxu1  ;;  %v235_v26 = vld [vmem:[%s4559_s1 + $0x520] sm:$0xff]  ;;  %v4568_v57 = vpack.i.bf16 %v3699_v8, %v3701_v18 }
 0x294   : > { %v3720_v16 = vmul.f32 %v2630_v0, %v234_v28  ;;  %v791_v60 = vpop.f32.mrb[29].mxu1 }
 0x295   : > { %v3722_v42 = vmul.f32 %v791_v60, %v233_v37 }
 0x297   : > { %v2750_v32 = vpack.c.bf16 %v3720_v16, %v3722_v42  ;;  %v2633_v50 = vpop.f32.mrb[30].mxu1 }
 0x298   : > { %v3734_v28 = vmul.f32 %v2633_v50, %v236_v7  ;;  %v801_v0 = vpop.f32.mrb[31].mxu1  ;;  %v245_v50 = vld [vmem:[%s4559_s1 + $0x580] sm:$0xff] }
 0x299   : > { %v3736_v60 = vmul.f32 %v801_v0, %v235_v26  ;;  %v249_v0 = vld [vmem:[%s4559_s1 + $0x5a0] sm:$0xff] }
 0x29a   : > { %2737 = vmatpush3.bf16.xpose.msk.msra.mxu1 %vm3616_vm3, %v2735_v15 }
 0x29b   : > { %2740 = vmatprep.subr.msk.bf16.mxu1 %vm3616_vm3, %v2738_v58  ;;  %v2756_v63 = vpack.c.bf16 %v3734_v28, %v3736_v60  ;;  %v247_v58 = vld [vmem:[%s4559_s1 + $0x590] sm:$0xff]  ;;  %v4572_v3 = vpack.i.bf16 %v3734_v28, %v3736_v60 }
 0x29c   : > { %v2772_v7 = vpack.c.bf16 %v247_v58, %v245_v50 }
 0x2a2   : > { %2743 = vmatpush3.bf16.xpose.msk.msra.mxu1 %vm3616_vm3, %v2741_v23  ;;  %v241_v23 = vld [vmem:[%s4559_s1 + $0x560] sm:$0xff] }
 0x2a3   : > { %2746 = vmatprep.subr.msk.bf16.mxu1 %vm3616_vm3, %v2744_v55  ;;  %v252_v55 = vld [vmem:[%s4559_s1 + $0x5b8] sm:$0xff] }
 0x2aa   : > { %2749 = vmatpush3.bf16.xpose.msk.msra.mxu1 %vm3616_vm3, %v2747_v33  ;;  %v246_v33 = vld [vmem:[%s4559_s1 + $0x588] sm:$0xff] }
 0x2ab   : > { %2752 = vmatprep.subr.msk.bf16.mxu1 %vm3616_vm3, %v2750_v32  ;;  %v243_v32 = vld [vmem:[%s4559_s1 + $0x570] sm:$0xff] }
 0x2b2   : > { %2755 = vmatpush3.bf16.xpose.msk.msra.mxu1 %vm3616_vm3, %v2753_v44  ;;  %v248_v44 = vld [vmem:[%s4559_s1 + $0x598] sm:$0xff] }
 0x2b3   : > { %2758 = vmatprep.subr.msk.bf16.mxu1 %vm3616_vm3, %v2756_v63  ;;  %v2770_v10 = vpack.c.bf16 %v248_v44, %v246_v33  ;;  %v250_v63 = vld [vmem:[%s4559_s1 + $0x5a8] sm:$0xff]  ;;  %v257_v33 = vld [vmem:[%s4559_s1 + $0x5e0] sm:$0xff]  ;;  %v259_v44 = vld [vmem:[%s4559_s1 + $0x5f0] sm:$0xff] }
 0x2b4   : > { %v2774_v26 = vpack.c.bf16 %v252_v55, %v250_v63  ;;  %v2784_v50 = vpack.c.bf16 %v259_v44, %v257_v33  ;;  %v261_v63 = vld [vmem:[%s4559_s1 + $0x600] sm:$0xff]  ;;  %v263_v55 = vld [vmem:[%s4559_s1 + $0x610] sm:$0xff] }
 0x2ba   : > { %2761 = vmatpush3.bf16.xpose.msk.msra.mxu1 %vm3616_vm3, %v2759_v61  ;;  %v2768_v61 = vpack.c.bf16 %v243_v32, %v241_v23 }
 0x2c1   : > { %2439 = vmatmul.mubr.msk.f32.vlgmr.msra.gmra.mrb[32].mxu1 %vm842_vm2, %v3315_v31  ;;  %v240_v31 = vld [vmem:[%s4559_s1 + $0x558] sm:$0xff] }
 0x2c2   : > { %2440 = vmatprep.mubr.msk.f32.mxu1 %vm842_vm2, %v3313_v29 }
 0x2c5   : > { %2441 = vmatmul.mubr.msk.f32.gmra.mrb[34].mxu1 %vm842_vm2, %v3313_v29  ;;  %v238_v29 = vld [vmem:[%s4559_s1 + $0x548] sm:$0xff] }
 0x2c6   : > { %2442 = vmatprep.mubr.msk.f32.mxu1 %vm842_vm2, %v3327_v38 }
 0x2c9   : > { %2443 = vmatmul.mubr.msk.f32.gmra.mrb[36].mxu1 %vm842_vm2, %v3327_v38  ;;  %v2762_v38 = vpack.c.bf16 %v240_v31, %v238_v29  ;;  %v251_v29 = vld [vmem:[%s4559_s1 + $0x5b0] sm:$0xff]  ;;  %v254_v31 = vld [vmem:[%s4559_s1 + $0x5c8] sm:$0xff] }
 0x2ca   : > { %2444 = vmatprep.mubr.msk.f32.mxu1 %vm842_vm2, %v3325_v36 }
 0x2cb   : > { %2763 = vmatprep.subr.bf16.mxu0 %v2762_v38  ;;  %v2776_v38 = vpack.c.bf16 %v251_v29, %v249_v0  ;;  %v2788_v0 = vpack.c.bf16 %v263_v55, %v261_v63 }
 0x2cd   : > { %2445 = vmatmul.mubr.msk.f32.gmra.mrb[38].mxu1 %vm842_vm2, %v3325_v36  ;;  %v237_v36 = vld [vmem:[%s4559_s1 + $0x540] sm:$0xff] }
 0x2ce   : > { %2446 = vmatprep.mubr.msk.f32.mxu1 %vm842_vm2, %v3340_v45 }
 0x2d1   : > { %2447 = vmatmul.mubr.msk.f32.gmra.mrb[40].mxu1 %vm842_vm2, %v3340_v45  ;;  %v242_v45 = vld [vmem:[%s4559_s1 + $0x568] sm:$0xff] }
 0x2d2   : > { %2448 = vmatprep.mubr.msk.f32.mxu1 %vm842_vm2, %v3338_v43 }
 0x2d5   : > { %2449 = vmatmul.mubr.msk.f32.gmra.mrb[42].mxu1 %vm842_vm2, %v3338_v43  ;;  %v239_v43 = vld [vmem:[%s4559_s1 + $0x550] sm:$0xff] }
 0x2d6   : > { %2450 = vmatprep.mubr.msk.f32.mxu1 %vm842_vm2, %v3357_v53 }
 0x2d9   : > { %2451 = vmatmul.mubr.msk.f32.gmra.mrb[44].mxu1 %vm842_vm2, %v3357_v53  ;;  %v2764_v53 = vpack.c.bf16 %v239_v43, %v237_v36  ;;  %v256_v36 = vld [vmem:[%s4559_s1 + $0x5d8] sm:$0xff] }
 0x2da   : > { %2452 = vmatprep.mubr.msk.f32.mxu1 %vm842_vm2, %v3355_v51  ;;  %v2778_v43 = vpack.c.bf16 %v256_v36, %v254_v31  ;;  %v265_v31 = vld [vmem:[%s4559_s1 + $0x620] sm:$0xff]  ;;  %v267_v36 = vld [vmem:[%s4559_s1 + $0x630] sm:$0xff] }
 0x2db   : > { %2765 = vmatpush1.bf16.msra.mxu0 %v2764_v53  ;;  %v258_v53 = vld [vmem:[%s4559_s1 + $0x5e8] sm:$0xff] }
 0x2dd   : > { %2453 = vmatmul.mubr.msk.f32.gmra.mrb[46].mxu1 %vm842_vm2, %v3355_v51  ;;  %v244_v51 = vld [vmem:[%s4559_s1 + $0x578] sm:$0xff] }
 0x2de   : > { %v2766_v15 = vpack.c.bf16 %v244_v51, %v242_v45  ;;  %v253_v45 = vld [vmem:[%s4559_s1 + $0x5c0] sm:$0xff]  ;;  %v255_v51 = vld [vmem:[%s4559_s1 + $0x5d0] sm:$0xff] }
 0x2df   : > { %v2780_v23 = vpack.c.bf16 %v255_v51, %v253_v45  ;;  %v2792_v45 = vpack.c.bf16 %v267_v36, %v265_v31 }
 0x2e0   : > { %2767 = vmatprep.subr.bf16.mxu0 %v2766_v15  ;;  %v260_v15 = vld [vmem:[%s4559_s1 + $0x5f8] sm:$0xff] }
 0x2e1   : > { %2769 = vmatpush1.bf16.msra.mxu0 %v2768_v61  ;;  %v2782_v32 = vpack.c.bf16 %v260_v15, %v258_v53  ;;  %v262_v61 = vld [vmem:[%s4559_s1 + $0x608] sm:$0xff]  ;;  %v269_v53 = vld [vmem:[%s4559_s1 + $0x640] sm:$0xff]  ;;  %v271_v15 = vld [vmem:[%s4559_s1 + $0x650] sm:$0xff] }
 0x2e2   : > { %2771 = vmatprep.subr.bf16.mxu0 %v2770_v10  ;;  %v264_v10 = vld [vmem:[%s4559_s1 + $0x618] sm:$0xff]  ;;  %v2796_v33 = vpack.c.bf16 %v271_v15, %v269_v53 }
 0x2e3   : > { %v2786_v58 = vpack.c.bf16 %v264_v10, %v262_v61  ;;  %v273_v61 = vld [vmem:[%s4559_s1 + $0x660] sm:$0xff]  ;;  %v275_v10 = vld [vmem:[%s4559_s1 + $0x670] sm:$0xff] }
 0x2e4   : > { %v2800_v63 = vpack.c.bf16 %v275_v10, %v273_v61 }
 0x2e5   : > { %2773 = vmatpush1.bf16.msra.mxu0 %v2772_v7  ;;  %v266_v7 = vld [vmem:[%s4559_s1 + $0x628] sm:$0xff] }
 0x2e6   : > { %2775 = vmatprep.subr.bf16.mxu0 %v2774_v26  ;;  %v268_v26 = vld [vmem:[%s4559_s1 + $0x638] sm:$0xff] }
 0x2e7   : > { %v2790_v29 = vpack.c.bf16 %v268_v26, %v266_v7  ;;  %v277_v7 = vld [vmem:[%s4559_s1 + $0x680] sm:$0xff]  ;;  %v279_v26 = vld [vmem:[%s4559_s1 + $0x690] sm:$0xff] }
 0x2e8   : > { %v2804_v31 = vpack.c.bf16 %v279_v26, %v277_v7  ;;  %v286_v7 = vld [vmem:[%s4559_s1 + $0x6c8] sm:$0xff]  ;;  %v288_v26 = vld [vmem:[%s4559_s1 + $0x6d8] sm:$0xff] }
 0x2e9   : > { %2777 = vmatpush1.bf16.msra.mxu0 %v2776_v38  ;;  %v270_v38 = vld [vmem:[%s4559_s1 + $0x648] sm:$0xff] }
 0x2ea   : > { %2779 = vmatprep.subr.bf16.mxu0 %v2778_v43  ;;  %v272_v43 = vld [vmem:[%s4559_s1 + $0x658] sm:$0xff] }
 0x2eb   : > { %v2794_v51 = vpack.c.bf16 %v272_v43, %v270_v38  ;;  %v281_v38 = vld [vmem:[%s4559_s1 + $0x6a0] sm:$0xff]  ;;  %v283_v43 = vld [vmem:[%s4559_s1 + $0x6b0] sm:$0xff] }
 0x2ed   : > { %2781 = vmatpush1.bf16.msra.mxu0 %v2780_v23  ;;  %v274_v23 = vld [vmem:[%s4559_s1 + $0x668] sm:$0xff] }
 0x2ee   : > { %2783 = vmatprep.subr.bf16.mxu0 %v2782_v32  ;;  %v276_v32 = vld [vmem:[%s4559_s1 + $0x678] sm:$0xff] }
 0x2ef   : > { %v2798_v44 = vpack.c.bf16 %v276_v32, %v274_v23 }
 0x2f1   : > { %2785 = vmatpush1.bf16.msra.mxu0 %v2784_v50  ;;  %v278_v50 = vld [vmem:[%s4559_s1 + $0x688] sm:$0xff] }
 0x2f2   : > { %2787 = vmatprep.subr.bf16.mxu0 %v2786_v58  ;;  %v280_v58 = vld [vmem:[%s4559_s1 + $0x698] sm:$0xff] }
 0x2f3   : > { %v2802_v55 = vpack.c.bf16 %v280_v58, %v278_v50 }
 0x2f5   : > { %2789 = vmatpush1.bf16.msra.mxu0 %v2788_v0  ;;  %v282_v0 = vld [vmem:[%s4559_s1 + $0x6a8] sm:$0xff] }
 0x2f6   : > { %2791 = vmatprep.subr.bf16.mxu0 %v2790_v29  ;;  %v284_v29 = vld [vmem:[%s4559_s1 + $0x6b8] sm:$0xff] }
 0x2f7   : > { %v2806_v36 = vpack.c.bf16 %v284_v29, %v282_v0  ;;  %v2810_v29 = vpack.c.bf16 %v288_v26, %v286_v7  ;;  %v289_v7 = vld [vmem:[%s4559_s1 + $0x6e0] sm:$0xff]  ;;  %v291_v26 = vld [vmem:[%s4559_s1 + $0x6f0] sm:$0xff] }
 0x2f9   : > { %2793 = vmatpush1.bf16.msra.mxu0 %v2792_v45  ;;  %v2808_v45 = vpack.c.bf16 %v283_v43, %v281_v38 }
 0x2fa   : > { %2795 = vmatprep.subr.bf16.mxu0 %v2794_v51 }
 0x2fd   : > { %2797 = vmatpush1.bf16.msra.mxu0 %v2796_v33 }
 0x2fe   : > { %2799 = vmatprep.subr.bf16.mxu0 %v2798_v44 }
 0x301   : > { %2801 = vmatpush1.bf16.msra.mxu0 %v2800_v63 }
 0x302   : > { %2803 = vmatprep.subr.bf16.mxu0 %v2802_v55 }
 0x305   : > { %2805 = vmatpush1.bf16.msra.mxu0 %v2804_v31  ;;  %v285_v31 = vld [vmem:[%s4559_s1 + $0x6c0] sm:$0xff] }
 0x306   : > { %2807 = vmatprep.subr.bf16.mxu0 %v2806_v36  ;;  %v287_v36 = vld [vmem:[%s4559_s1 + $0x6d0] sm:$0xff] }
 0x307   : > { %v2812_v43 = vpack.c.bf16 %v287_v36, %v285_v31  ;;  %v2816_v31 = vpack.c.bf16 %v291_v26, %v289_v7  ;;  %v293_v7 = vld [vmem:[%s4559_s1 + $0x700] sm:$0xff] }
 0x309   : > { %2809 = vmatpush1.bf16.msra.mxu0 %v2808_v45 }
 0x30a   : > { %2811 = vmatprep.subr.bf16.mxu0 %v2810_v29 }
 0x30d   : > { %2813 = vmatpush1.bf16.msra.mxu0 %v2812_v43  ;;  %v296_v43 = vld [vmem:[%s4559_s1 + $0x718] sm:$0xff] }
 0x394   : > { %v3949_v51 = vpop.f32.mrb[32].mxu1 }
 0x395   : > { %v3951_v53 = vpop.f32.mrb[33].mxu1 }
 0x396   : > { %v1068_v15 = vmax.f32 %v3949_v51, %v3951_v53 }
 0x398   : > { %1069 = vmax.xlane.f32.xlu0 %v1068_v15  ;;  %v3955_v23 = vpop.f32.mrb[34].mxu1  ;;  %v290_v15 = vld [vmem:[%s4559_s1 + $0x6e8] sm:$0xff] }
 0x399   : > { %v3957_v32 = vpop.f32.mrb[35].mxu1 }
 0x39a   : > { %v1071_v33 = vmax.f32 %v3955_v23, %v3957_v32 }
 0x39c   : > { %1072 = vmax.xlane.f32.xlu1 %v1071_v33  ;;  %v3961_v44 = vpop.f32.mrb[36].mxu1  ;;  %v292_v33 = vld [vmem:[%s4559_s1 + $0x6f8] sm:$0xff] }
 0x39d   : > { %v3963_v61 = vpop.f32.mrb[37].mxu1 }
 0x39e   : > { %v1074_v10 = vmax.f32 %v3961_v44, %v3963_v61 }
 0x3a0   : > { %1075 = vmax.xlane.f32.xlu0 %v1074_v10  ;;  %v3967_v50 = vpop.f32.mrb[38].mxu1 }
 0x3a1   : > { %v3969_v58 = vpop.f32.mrb[39].mxu1 }
 0x3a2   : > { %v1077_v63 = vmax.f32 %v3967_v50, %v3969_v58 }
 0x3a4   : > { %1078 = vmax.xlane.f32.xlu0 %v1077_v63  ;;  %v3973_v55 = vpop.f32.mrb[40].mxu1  ;;  %v2814_v63 = vpack.c.bf16 %v292_v33, %v290_v15 }
 0x3a5   : > { %v3981_v0 = vpop.f32.mrb[41].mxu1 }
 0x3a6   : > { %v1080_v38 = vmax.f32 %v3973_v55, %v3981_v0  ;;  %2815 = vmatprep.subr.bf16.mxu0 %v2814_v63  ;;  %v295_v63 = vld [vmem:[%s4559_s1 + $0x710] sm:$0xff] }
 0x3a7   : > { %2817 = vmatpush1.bf16.msra.mxu0 %v2816_v31 }
 0x3a8   : > { %1081 = vmax.xlane.f32.xlu1 %v1080_v38  ;;  %v3991_v45 = vpop.f32.mrb[42].mxu1  ;;  %v294_v38 = vld [vmem:[%s4559_s1 + $0x708] sm:$0xff] }
 0x3a9   : > { %v3999_v10 = vpop.f32.mrb[43].mxu1  ;;  %v2818_v33 = vpack.c.bf16 %v296_v43, %v294_v38  ;;  %v298_v38 = vld [vmem:[%s4559_s1 + $0x728] sm:$0xff]  ;;  %v300_v43 = vld [vmem:[%s4559_s1 + $0x738] sm:$0xff] }
 0x3aa   : > { %v1083_v29 = vmax.f32 %v3991_v45, %v3999_v10  ;;  %v2822_v22 = vpack.c.bf16 %v300_v43, %v298_v38 }
 0x3ab   : > { %2819 = vmatprep.subr.bf16.mxu0 %v2818_v33  ;;  %v299_v33 = vld [vmem:[%s4559_s1 + $0x730] sm:$0xff] }
 0x3ac   : > { %1084 = vmax.xlane.f32.xlu0 %v1083_v29  ;;  %v4009_v36 = vpop.f32.mrb[44].mxu1  ;;  %v2820_v29 = vpack.c.bf16 %v295_v63, %v293_v7  ;;  %v297_v7 = vld [vmem:[%s4559_s1 + $0x720] sm:$0xff] }
 0x3ad   : > { %v4017_v15 = vpop.f32.mrb[45].mxu1 }
 0x3ae   : > { %v1086_v26 = vmax.f32 %v4009_v36, %v4017_v15  ;;  %2821 = vmatpush1.bf16.msra.mxu0 %v2820_v29 }
 0x3af   : > { %2823 = vmatprep.subr.bf16.mxu0 %v2822_v22 }
 0x3b0   : > { %1087 = vmax.xlane.f32.xlu1 %v1086_v26  ;;  %v4027_v31 = vpop.f32.mrb[46].mxu1  ;;  %v2824_v26 = vpack.c.bf16 %v299_v33, %v297_v7 }
 0x3b1   : > { %v4035_v37 = vpop.f32.mrb[47].mxu1 }
 0x3b2   : > { %v1089_v63 = vmax.f32 %v4027_v31, %v4035_v37  ;;  %2825 = vmatpush1.bf16.msra.mxu0 %v2824_v26 }
 0x3b4   : > { %1090 = vmax.xlane.f32.xlu0 %v1089_v63 }
 0x3c1   : > { %2942 = vrot.lane.b32.xlu1 %v2941_v13, %s3181_s17 }
 0x3c5   : > { %2952 = vrot.lane.b32.xlu1 %v2951_v30, %s3181_s17 }
 0x3c9   : > { %2957 = vrot.lane.b32.xlu1 %v2956_v62, %s3181_s17  ;;  %v4570_v62 = vpack.i.bf16 %v3720_v16, %v3722_v42 }
 0x3ca   : > { %2947 = vrot.lane.b32.xlu0 %v2946_v54, %s3181_s17  ;;  %v4567_v54 = vpack.i.bf16 %v3565_v25, %v3567_v27 }
 0x3cd   : > { %2967 = vrot.lane.b32.xlu1 %v2966_v6, %s3181_s17 }
 0x3ce   : > { %2962 = vrot.lane.b32.xlu0 %v2961_v56, %s3181_s17 }
 0x3d1   : > { %2977 = vrot.lane.b32.xlu1 %v2976_v14, %s3181_s17 }
 0x3d2   : > { %2972 = vrot.lane.b32.xlu0 %v2971_v21, %s3181_s17 }
 0x3d5   : > { %2987 = vrot.lane.b32.xlu1 %v4565_v47, %s3181_s17 }
 0x3d6   : > { %2982 = vrot.lane.b32.xlu0 %v4566_v49, %s3181_s17 }
 0x3d9   : > { %2997 = vrot.lane.b32.xlu1 %v4567_v54, %s3181_s17 }
 0x3da   : > { %2992 = vrot.lane.b32.xlu0 %v4568_v57, %s3181_s17 }
 0x3dd   : > { %3007 = vrot.lane.b32.xlu1 %v4569_v59, %s3181_s17 }
 0x3de   : > { %3002 = vrot.lane.b32.xlu0 %v4570_v62, %s3181_s17 }
 0x3e1   : > { %3017 = vrot.lane.b32.xlu1 %v4571_v1, %s3181_s17 }
 0x3e2   : > { %3012 = vrot.lane.b32.xlu0 %v4572_v3, %s3181_s17 }
 0x425   : > { %v1070_v6 = vpop.xlane.xlu0 %1069 }
 0x426   : > { %v1092_v9 = vsub.f32 %v3949_v51, %v1070_v6  ;;  %v1093_v11 = vsub.f32 %v3951_v53, %v1070_v6 }
 0x428   : > { %v1108_v14 = vmul.f32 1.442695, %v1092_v9  ;;  %v1110_v17 = vmul.f32 1.442695, %v1093_v11 }
 0x429   : > { %v1073_v19 = vpop.xlane.xlu1 %1072 }
 0x42a   : > { %3021 = vpow2.f32 %v1108_v14  ;;  %v1094_v22 = vsub.f32 %v3955_v23, %v1073_v19  ;;  %v1095_v25 = vsub.f32 %v3957_v32, %v1073_v19 }
 0x42b   : > { %3023 = vpow2.f32 %v1110_v17 }
 0x42c   : > { %v1112_v27 = vmul.f32 1.442695, %v1094_v22  ;;  %v1114_v35 = vmul.f32 1.442695, %v1095_v25 }
 0x42d   : > { %v1076_v39 = vpop.xlane.xlu0 %1075 }
 0x42e   : > { %3025 = vpow2.f32 %v1112_v27  ;;  %v1096_v42 = vsub.f32 %v3961_v44, %v1076_v39  ;;  %v1097_v48 = vsub.f32 %v3963_v61, %v1076_v39 }
 0x42f   : > { %3027 = vpow2.f32 %v1114_v35 }
 0x430   : > { %v1116_v52 = vmul.f32 1.442695, %v1096_v42  ;;  %v1118_v2 = vmul.f32 1.442695, %v1097_v48 }
 0x431   : > { %v1079_v5 = vpop.xlane.xlu0 %1078 }
 0x432   : > { %3029 = vpow2.f32 %v1116_v52  ;;  %v1098_v13 = vsub.f32 %v3967_v50, %v1079_v5  ;;  %v1099_v20 = vsub.f32 %v3969_v58, %v1079_v5 }
 0x433   : > { %3031 = vpow2.f32 %v1118_v2 }
 0x434   : > { %v4117_v24 = vpop.eup %3021  ;;  %v1120_v30 = vmul.f32 1.442695, %v1098_v13  ;;  %v1122_v40 = vmul.f32 1.442695, %v1099_v20 }
 0x435   : > { %v4119_v46 = vpop.eup %3023  ;;  %v1082_v56 = vpop.xlane.xlu1 %1081 }
 0x436   : > { %3033 = vpow2.f32 %v1120_v30  ;;  %1204 = vmatprep.mubr.f32.mxu0 %v4119_v46  ;;  %v1100_v4 = vsub.f32 %v3973_v55, %v1082_v56  ;;  %v1101_v12 = vsub.f32 %v3981_v0, %v1082_v56 }
 0x437   : > { %3035 = vpow2.f32 %v1122_v40  ;;  %1205 = vmatmul.mubr.f32.vlgmr.msra.gmra.mrb[8].mxu0 %v4117_v24 }
 0x438   : > { %v4125_v21 = vpop.eup %3025  ;;  %v1124_v34 = vmul.f32 1.442695, %v1100_v4  ;;  %v1126_v41 = vmul.f32 1.442695, %v1101_v12 }
 0x439   : > { %v4127_v8 = vpop.eup %3027  ;;  %v1085_v18 = vpop.xlane.xlu0 %1084 }
 0x43a   : > { %3037 = vpow2.f32 %v1124_v34  ;;  %1210 = vmatprep.mubr.f32.mxu0 %v4127_v8  ;;  %v1102_v16 = vsub.f32 %v3991_v45, %v1085_v18  ;;  %v1103_v28 = vsub.f32 %v3999_v10, %v1085_v18 }
 0x43b   : > { %3039 = vpow2.f32 %v1126_v41  ;;  %1211 = vmatmul.mubr.f32.gmra.mrb[10].mxu0 %v4125_v21 }
 0x43c   : > { %v4133_v60 = vpop.eup %3029  ;;  %v1128_v51 = vmul.f32 1.442695, %v1102_v16  ;;  %v1130_v53 = vmul.f32 1.442695, %v1103_v28 }
 0x43d   : > { %v4135_v23 = vpop.eup %3031  ;;  %v1088_v32 = vpop.xlane.xlu1 %1087 }
 0x43e   : > { %3041 = vpow2.f32 %v1128_v51  ;;  %1216 = vmatprep.mubr.f32.mxu0 %v4135_v23  ;;  %v1104_v44 = vsub.f32 %v4009_v36, %v1088_v32  ;;  %v1105_v61 = vsub.f32 %v4017_v15, %v1088_v32 }
 0x43f   : > { %3043 = vpow2.f32 %v1130_v53  ;;  %1217 = vmatmul.mubr.f32.gmra.mrb[12].mxu0 %v4133_v60 }
 0x440   : > { %v4141_v50 = vpop.eup %3033  ;;  %v1132_v58 = vmul.f32 1.442695, %v1104_v44  ;;  %v1134_v55 = vmul.f32 1.442695, %v1105_v61 }
 0x441   : > { %v4143_v0 = vpop.eup %3035  ;;  %v2943_v45 = vpop.permute.xlu1 %2942 }
 0x442   : > { %v1091_v10 = vpop.xlane.xlu0 %1090  ;;  %3045 = vpow2.f32 %v1132_v58  ;;  %1222 = vmatprep.mubr.f32.mxu0 %v4143_v0  ;;  %v2945_v29 = vunpack.i.h.bf16 %v2943_v45  ;;  %v2944_v38 = vunpack.i.l.bf16 %v2943_v45 }
 0x443   : > { %v1106_v36 = vsub.f32 %v4027_v31, %v1091_v10  ;;  %3047 = vpow2.f32 %v1134_v55  ;;  %v1107_v15 = vsub.f32 %v4035_v37, %v1091_v10  ;;  %1223 = vmatmul.mubr.f32.gmra.mrb[14].mxu0 %v4141_v50 }
 0x444   : > { %v4149_v43 = vpop.eup %3037  ;;  %v2826_v7 = vpack.c.bf16 %v2945_v29, %v2944_v38 }
 0x445   : > { %v1136_v33 = vmul.f32 1.442695, %v1106_v36  ;;  %v4151_v63 = vpop.eup %3039  ;;  %v1138_v26 = vmul.f32 1.442695, %v1107_v15  ;;  %v2953_v47 = vpop.permute.xlu1 %2952 }
 0x446   : > { %v2948_v49 = vpop.permute.xlu0 %2947  ;;  %1228 = vmatprep.mubr.f32.mxu0 %v4151_v63  ;;  %v2955_v54 = vunpack.i.h.bf16 %v2953_v47  ;;  %v2954_v57 = vunpack.i.l.bf16 %v2953_v47  ;;  %2827 = vmatprep.subr.bf16.mxu1 %v2826_v7 }
 0x447   : > { %3049 = vpow2.f32 %v1136_v33  ;;  %v2950_v31 = vunpack.i.h.bf16 %v2948_v49  ;;  %v2949_v37 = vunpack.i.l.bf16 %v2948_v49  ;;  %1229 = vmatmul.mubr.f32.gmra.mrb[16].mxu0 %v4149_v43 }
 0x448   : > { %3051 = vpow2.f32 %v1138_v26  ;;  %v4155_v59 = vpop.eup %3041  ;;  %v2830_v62 = vpack.c.bf16 %v2955_v54, %v2954_v57 }
 0x449   : > { %v4157_v1 = vpop.eup %3043  ;;  %v2828_v3 = vpack.c.bf16 %v2950_v31, %v2949_v37  ;;  %v2958_v6 = vpop.permute.xlu1 %2957 }
 0x44a   : > { %v2963_v9 = vpop.permute.xlu0 %2962  ;;  %1234 = vmatprep.mubr.f32.mxu0 %v4157_v1  ;;  %v2960_v11 = vunpack.i.h.bf16 %v2958_v6  ;;  %v2959_v14 = vunpack.i.l.bf16 %v2958_v6 }
 0x44b   : > { %v2965_v17 = vunpack.i.h.bf16 %v2963_v9  ;;  %v2964_v19 = vunpack.i.l.bf16 %v2963_v9  ;;  %1235 = vmatmul.mubr.f32.gmra.mrb[18].mxu0 %v4155_v59  ;;  %2829 = vmatpush3.bf16.msra.mxu1 %v2828_v3 }
 0x44c   : > { %v4161_v22 = vpop.eup %3045  ;;  %v2832_v25 = vpack.c.bf16 %v2960_v11, %v2959_v14  ;;  %2831 = vmatprep.subr.bf16.mxu1 %v2830_v62 }
 0x44d   : > { %v2834_v27 = vpack.c.bf16 %v2965_v17, %v2964_v19  ;;  %v4163_v35 = vpop.eup %3047  ;;  %v2968_v39 = vpop.permute.xlu1 %2967  ;;  %v317_v17 = vld [vmem:[%s4559_s1 + $0x7c0] sm:$0xff]  ;;  %v318_v19 = vld [vmem:[%s4559_s1 + $0x7d0] sm:$0xff] }
 0x44e   : > { %v2973_v42 = vpop.permute.xlu0 %2972  ;;  %1240 = vmatprep.mubr.f32.mxu0 %v4163_v35  ;;  %v2970_v48 = vunpack.i.h.bf16 %v2968_v39  ;;  %v2969_v52 = vunpack.i.l.bf16 %v2968_v39  ;;  %v320_v39 = vld [vmem:[%s4559_s1 + $0x7f0] sm:$0xff] }
 0x44f   : > { %v2975_v2 = vunpack.i.h.bf16 %v2973_v42  ;;  %v2974_v5 = vunpack.i.l.bf16 %v2973_v42  ;;  %1241 = vmatmul.mubr.f32.gmra.mrb[20].mxu0 %v4161_v22  ;;  %2833 = vmatpush3.bf16.msra.mxu1 %v2832_v25  ;;  %v319_v25 = vld [vmem:[%s4559_s1 + $0x7e0] sm:$0xff] }
 0x450   : > { %v2836_v20 = vpack.c.bf16 %v2970_v48, %v2969_v52  ;;  %2835 = vmatprep.subr.bf16.mxu1 %v2834_v27  ;;  %v2858_v27 = vpack.c.bf16 %v318_v19, %v317_v17  ;;  %v2862_v42 = vpack.c.bf16 %v320_v39, %v319_v25 }
 0x451   : > { %v4167_v13 = vpop.eup %3049  ;;  %v2838_v30 = vpack.c.bf16 %v2975_v2, %v2974_v5  ;;  %v2978_v56 = vpop.permute.xlu1 %2977 }
 0x452   : > { %v4169_v40 = vpop.eup %3051  ;;  %v2983_v4 = vpop.permute.xlu0 %2982  ;;  %v2980_v12 = vunpack.i.h.bf16 %v2978_v56  ;;  %v2979_v34 = vunpack.i.l.bf16 %v2978_v56  ;;  %2859 = vmatprep.subr.bf16.mxu0 %v2858_v27 }
 0x453   : > { %1246 = vmatprep.mubr.f32.mxu0 %v4169_v40  ;;  %v2985_v41 = vunpack.i.h.bf16 %v2983_v4  ;;  %v2984_v18 = vunpack.i.l.bf16 %v2983_v4  ;;  %2837 = vmatpush3.bf16.msra.mxu1 %v2836_v20 }
 0x454   : > { %1247 = vmatmul.mubr.f32.gmra.mrb[22].mxu0 %v4167_v13  ;;  %v2840_v16 = vpack.c.bf16 %v2980_v12, %v2979_v34  ;;  %2839 = vmatprep.subr.bf16.mxu1 %v2838_v30 }
 0x455   : > { %v2842_v28 = vpack.c.bf16 %v2985_v41, %v2984_v18  ;;  %v2988_v51 = vpop.permute.xlu1 %2987  ;;  %2861 = vmatpush3.bf16.msra.mxu0 %v2858_v27  ;;  %v302_v41 = vld [vmem:[%s4559_s1 + $0x748] sm:$0xff] }
 0x456   : > { %v2993_v53 = vpop.permute.xlu0 %2992  ;;  %v2990_v32 = vunpack.i.h.bf16 %v2988_v51  ;;  %v2989_v44 = vunpack.i.l.bf16 %v2988_v51  ;;  %2863 = vmatprep.subr.bf16.mxu0 %v2862_v42 }
 0x457   : > { %v2995_v61 = vunpack.i.h.bf16 %v2993_v53  ;;  %v2994_v58 = vunpack.i.l.bf16 %v2993_v53  ;;  %2841 = vmatpush3.bf16.msra.mxu1 %v2840_v16 }
 0x458   : > { %v2844_v55 = vpack.c.bf16 %v2990_v32, %v2989_v44  ;;  %2843 = vmatprep.subr.bf16.mxu1 %v2842_v28  ;;  %v301_v28 = vld [vmem:[%s4559_s1 + $0x740] sm:$0xff] }
 0x459   : > { %v2846_v45 = vpack.c.bf16 %v2995_v61, %v2994_v58  ;;  %v2998_v10 = vpop.permute.xlu1 %2997  ;;  %2865 = vmatpush3.bf16.msra.mxu0 %v2862_v42 }
 0x45a   : > { %v3003_v29 = vpop.permute.xlu0 %3002  ;;  %v3000_v38 = vunpack.i.h.bf16 %v2998_v10  ;;  %v2999_v36 = vunpack.i.l.bf16 %v2998_v10 }
 0x45b   : > { %v3005_v15 = vunpack.i.h.bf16 %v3003_v29  ;;  %v3004_v7 = vunpack.i.l.bf16 %v3003_v29  ;;  %2845 = vmatpush3.bf16.msra.mxu1 %v2844_v55 }
 0x45c   : > { %v2848_v33 = vpack.c.bf16 %v3000_v38, %v2999_v36  ;;  %2847 = vmatprep.subr.bf16.mxu1 %v2846_v45  ;;  %v303_v45 = vld [vmem:[%s4559_s1 + $0x750] sm:$0xff] }
 0x45d   : > { %v2850_v26 = vpack.c.bf16 %v3005_v15, %v3004_v7  ;;  %v3008_v47 = vpop.permute.xlu1 %3007 }
 0x45e   : > { %v3013_v49 = vpop.permute.xlu0 %3012  ;;  %v3010_v54 = vunpack.i.h.bf16 %v3008_v47  ;;  %v3009_v57 = vunpack.i.l.bf16 %v3008_v47 }
 0x45f   : > { %v3015_v31 = vunpack.i.h.bf16 %v3013_v49  ;;  %v3014_v37 = vunpack.i.l.bf16 %v3013_v49  ;;  %2849 = vmatpush3.bf16.msra.mxu1 %v2848_v33 }
 0x460   : > { %v2852_v62 = vpack.c.bf16 %v3010_v54, %v3009_v57  ;;  %2851 = vmatprep.subr.bf16.mxu1 %v2850_v26  ;;  %v305_v26 = vld [vmem:[%s4559_s1 + $0x760] sm:$0xff] }
 0x461   : > { %v2854_v3 = vpack.c.bf16 %v3015_v31, %v3014_v37  ;;  %v3018_v6 = vpop.permute.xlu1 %3017 }
 0x462   : > { %v3020_v9 = vunpack.i.h.bf16 %v3018_v6  ;;  %v3019_v11 = vunpack.i.l.bf16 %v3018_v6 }
 0x463   : > { %2853 = vmatpush3.bf16.msra.mxu1 %v2852_v62 }
 0x464   : > { %v2856_v14 = vpack.c.bf16 %v3020_v9, %v3019_v11  ;;  %2855 = vmatprep.subr.bf16.mxu1 %v2854_v3  ;;  %v307_v3 = vld [vmem:[%s4559_s1 + $0x770] sm:$0xff] }
 0x467   : > { %2857 = vmatpush3.bf16.msra.mxu1 %v2856_v14 }
 0x468   : > { %2874 = vmatprep.subr.bf16.mxu1 %v2858_v27 }
 0x50a   : > { %v1206_v48 = vpop.f32.mrb[8].mxu0 }
 0x50b   : > { %3053 = vrcp.f32 %v1206_v48  ;;  %v1208_v52 = vpop.f32.mrb[9].mxu0 }
 0x50c   : > { %3055 = vrcp.f32 %v1208_v52 }
 0x50e   : > { %v1212_v2 = vpop.f32.mrb[10].mxu0 }
 0x50f   : > { %3057 = vrcp.f32 %v1212_v2  ;;  %v1214_v5 = vpop.f32.mrb[11].mxu0  ;;  %v312_v2 = vld [vmem:[%s4559_s1 + $0x798] sm:$0xff] }
 0x510   : > { %3059 = vrcp.f32 %v1214_v5 }
 0x512   : > { %v1218_v20 = vpop.f32.mrb[12].mxu0 }
 0x513   : > { %3061 = vrcp.f32 %v1218_v20  ;;  %v1220_v30 = vpop.f32.mrb[13].mxu0 }
 0x514   : > { %3063 = vrcp.f32 %v1220_v30 }
 0x515   : > { %v3054_v56 = vpop.eup %3053 }
 0x516   : > { %v3056_v4 = vpop.eup %3055  ;;  %v1254_v12 = vmul.f32 %v3054_v56, %v4117_v24  ;;  %v1224_v34 = vpop.f32.mrb[14].mxu0  ;;  %v304_v24 = vld [vmem:[%s4559_s1 + $0x758] sm:$0xff] }
 0x517   : > { %3065 = vrcp.f32 %v1224_v34  ;;  %v1226_v18 = vpop.f32.mrb[15].mxu0  ;;  %v1256_v16 = vmul.f32 %v3056_v4, %v4119_v46 }
 0x518   : > { %3067 = vrcp.f32 %v1226_v18  ;;  %v1285_v61 = vmul.f32 %v1254_v12, %v301_v28  ;;  %v314_v12 = vld [vmem:[%s4559_s1 + $0x7a8] sm:$0xff] }
 0x519   : > { %v3058_v51 = vpop.eup %3057  ;;  %v1286_v53 = vmul.f32 %v1256_v16, %v302_v41 }
 0x51a   : > { %v3060_v32 = vpop.eup %3059  ;;  %v1230_v44 = vpop.f32.mrb[16].mxu0  ;;  %v1258_v58 = vmul.f32 %v3058_v51, %v4125_v21  ;;  %v306_v21 = vld [vmem:[%s4559_s1 + $0x768] sm:$0xff]  ;;  %v316_v51 = vld [vmem:[%s4559_s1 + $0x7b8] sm:$0xff] }
 0x51b   : > { %3069 = vrcp.f32 %v1230_v44  ;;  %v1232_v55 = vpop.f32.mrb[17].mxu0  ;;  %1461 = vmatprep.mubr.f32.mxu1 %v1286_v53  ;;  %v1260_v46 = vmul.f32 %v3060_v32, %v4127_v8 }
 0x51c   : > { %3071 = vrcp.f32 %v1232_v55  ;;  %1462 = vmatmul.mubr.f32.vlgmr.msra.gmra.mrb[48].mxu1 %v1285_v61  ;;  %v1287_v15 = vmul.f32 %v1258_v58, %v303_v45 }
 0x51d   : > { %v3062_v10 = vpop.eup %3061  ;;  %v1288_v29 = vmul.f32 %v1260_v46, %v304_v24  ;;  %2876 = vmatpush3.bf16.msra.mxu1 %v2858_v27  ;;  %v309_v27 = vld [vmem:[%s4559_s1 + $0x780] sm:$0xff] }
 0x51e   : > { %v3064_v38 = vpop.eup %3063  ;;  %v1236_v36 = vpop.f32.mrb[18].mxu0  ;;  %v1262_v7 = vmul.f32 %v3062_v10, %v4133_v60  ;;  %2875 = vmatprep.subr.bf16.mxu1 %v2862_v42  ;;  %v308_v60 = vld [vmem:[%s4559_s1 + $0x778] sm:$0xff] }
 0x51f   : > { %3073 = vrcp.f32 %v1236_v36  ;;  %v1238_v8 = vpop.f32.mrb[19].mxu0  ;;  %1466 = vmatprep.mubr.f32.mxu1 %v1288_v29  ;;  %v1264_v33 = vmul.f32 %v3064_v38, %v4135_v23 }
 0x520   : > { %3075 = vrcp.f32 %v1238_v8  ;;  %1467 = vmatmul.mubr.f32.gmra.mrb[50].mxu1 %v1287_v15  ;;  %v1289_v31 = vmul.f32 %v1262_v7, %v305_v26 }
 0x521   : > { %v3066_v47 = vpop.eup %3065  ;;  %v1290_v49 = vmul.f32 %v1264_v33, %v306_v21  ;;  %2877 = vmatpush3.bf16.msra.mxu1 %v2862_v42 }
 0x522   : > { %v3068_v54 = vpop.eup %3067  ;;  %v1242_v57 = vpop.f32.mrb[20].mxu0  ;;  %v1266_v37 = vmul.f32 %v3066_v47, %v4141_v50  ;;  %v310_v50 = vld [vmem:[%s4559_s1 + $0x788] sm:$0xff] }
 0x523   : > { %3077 = vrcp.f32 %v1242_v57  ;;  %v1244_v23 = vpop.f32.mrb[21].mxu0  ;;  %1471 = vmatprep.mubr.f32.mxu1 %v1290_v49  ;;  %v1268_v62 = vmul.f32 %v3068_v54, %v4143_v0 }
 0x524   : > { %3079 = vrcp.f32 %v1244_v23  ;;  %1472 = vmatmul.mubr.f32.gmra.mrb[52].mxu1 %v1289_v31  ;;  %v1291_v17 = vmul.f32 %v1266_v37, %v307_v3  ;;  %v1502_v37 = vlaneseq  ;;  %v4263_v3 = vld [vmem:[%s4559_s1 + $0x840] sm:$0xff] }
 0x525   : > { %v3070_v6 = vpop.eup %3069  ;;  %v1292_v9 = vmul.f32 %v1268_v62, %v308_v60 }
 0x526   : > { %v3072_v11 = vpop.eup %3071  ;;  %v1270_v19 = vmul.f32 %v3070_v6, %v4149_v43  ;;  %v4257_v23 = vshrl.u32 %v1502_v37, 7 }
 0x527   : > { %v1248_v14 = vpop.f32.mrb[22].mxu0  ;;  %1476 = vmatprep.mubr.f32.mxu1 %v1292_v9  ;;  %v1272_v0 = vmul.f32 %v3072_v11, %v4151_v63  ;;  %v311_v63 = vld [vmem:[%s4559_s1 + $0x790] sm:$0xff] }
 0x528   : > { %3081 = vrcp.f32 %v1248_v14  ;;  %v1250_v25 = vpop.f32.mrb[23].mxu0  ;;  %1477 = vmatmul.mubr.f32.gmra.mrb[54].mxu1 %v1291_v17  ;;  %v1293_v52 = vmul.f32 %v1270_v19, %v309_v27  ;;  %v1504_v62 = vsub.s32 0, %v4257_v23 }
 0x529   : > { %3083 = vrcp.f32 %v1250_v25  ;;  %v3074_v39 = vpop.eup %3073  ;;  %v1294_v42 = vmul.f32 %v1272_v0, %v310_v50 }
 0x52a   : > { %v3076_v48 = vpop.eup %3075  ;;  %v1274_v43 = vmul.f32 %v3074_v39, %v4155_v59  ;;  %v1505_v6 = vrot.slane %v4263_v3, %v1504_v62 }
 0x52b   : > { %1481 = vmatprep.mubr.f32.mxu1 %v1294_v42  ;;  %v1276_v5 = vmul.f32 %v3076_v48, %v4157_v1  ;;  %v313_v1 = vld [vmem:[%s4559_s1 + $0x7a0] sm:$0xff] }
 0x52c   : > { %1482 = vmatmul.mubr.f32.gmra.mrb[56].mxu1 %v1293_v52  ;;  %v1295_v4 = vmul.f32 %v1274_v43, %v311_v63 }
 0x52d   : > { %v3078_v20 = vpop.eup %3077  ;;  %v1296_v30 = vmul.f32 %v1276_v5, %v312_v2 }
 0x52e   : > { %v3080_v56 = vpop.eup %3079  ;;  %v1278_v34 = vmul.f32 %v3078_v20, %v4161_v22 }
 0x52f   : > { %1486 = vmatprep.mubr.f32.mxu1 %v1296_v30  ;;  %v1280_v59 = vmul.f32 %v3080_v56, %v4163_v35  ;;  %v315_v35 = vld [vmem:[%s4559_s1 + $0x7b0] sm:$0xff] }
 0x530   : > { %1487 = vmatmul.mubr.f32.gmra.mrb[58].mxu1 %v1295_v4  ;;  %v1297_v28 = vmul.f32 %v1278_v34, %v313_v1 }
 0x531   : > { %v1298_v18 = vmul.f32 %v1280_v59, %v314_v12 }
 0x532   : > { %v3082_v41 = vpop.eup %3081 }
 0x533   : > { %v3084_v16 = vpop.eup %3083  ;;  %v1282_v53 = vmul.f32 %v3082_v41, %v4167_v13  ;;  %1491 = vmatprep.mubr.f32.mxu1 %v1298_v18 }
 0x534   : > { %v1284_v22 = vmul.f32 %v3084_v16, %v4169_v40  ;;  %1492 = vmatmul.mubr.f32.gmra.mrb[60].mxu1 %v1297_v28 }
 0x535   : > { %v1299_v44 = vmul.f32 %v1282_v53, %v315_v35 }
 0x536   : > { %v1300_v32 = vmul.f32 %v1284_v22, %v316_v51 }
 0x538   : > { %1496 = vmatprep.mubr.f32.mxu1 %v1300_v32 }
 0x539   : > { %1497 = vmatmul.mubr.f32.gmra.mrb[62].mxu1 %v1299_v44 }
 0x5ef   : > { %v2486_v61 = vpop.f32.mrb[48].mxu1 }
 0x5f0   : > { %v2487_v24 = vpop.f32.mrb[49].mxu1 }
 0x5f1   : > { %v2488_v58 = vadd.f32 %v2487_v24, %v2486_v61 }
 0x5f3   : > { %v2489_v55 = vpop.f32.mrb[50].mxu1  ;;  %2642 = vmatprep.mubr.msk.f32.mxu0 %vm842_vm2, %v2488_v58 }
 0x5f4   : > { %v2490_v46 = vpop.f32.mrb[51].mxu1 }
 0x5f5   : > { %v2491_v13 = vadd.f32 %v2490_v46, %v2489_v55 }
 0x5f7   : > { %v2492_v45 = vpop.f32.mrb[52].mxu1  ;;  %2643 = vmatmul.mubr.msk.f32.vlgmr.msra.gmra.mrb[24].mxu0 %vm842_vm2, %v2491_v13 }
 0x5f8   : > { %v2493_v40 = vpop.f32.mrb[53].mxu1 }
 0x5f9   : > { %v2494_v10 = vadd.f32 %v2493_v40, %v2492_v45 }
 0x5fb   : > { %v2495_v29 = vpop.f32.mrb[54].mxu1  ;;  %2645 = vmatprep.mubr.msk.f32.mxu0 %vm842_vm2, %v2494_v10 }
 0x5fc   : > { %v2496_v38 = vpop.f32.mrb[55].mxu1 }
 0x5fd   : > { %v2497_v36 = vadd.f32 %v2496_v38, %v2495_v29 }
 0x5ff   : > { %v2498_v15 = vpop.f32.mrb[56].mxu1  ;;  %2646 = vmatmul.mubr.msk.f32.gmra.mrb[26].mxu0 %vm842_vm2, %v2497_v36 }
 0x600   : > { %v2499_v21 = vpop.f32.mrb[57].mxu1 }
 0x601   : > { %v2500_v7 = vadd.f32 %v2499_v21, %v2498_v15 }
 0x603   : > { %v2501_v8 = vpop.f32.mrb[58].mxu1  ;;  %2648 = vmatprep.mubr.msk.f32.mxu0 %vm842_vm2, %v2500_v7 }
 0x604   : > { %v2502_v33 = vpop.f32.mrb[59].mxu1 }
 0x605   : > { %v2503_v26 = vadd.f32 %v2502_v33, %v2501_v8 }
 0x607   : > { %v2504_v47 = vpop.f32.mrb[60].mxu1  ;;  %2649 = vmatmul.mubr.msk.f32.gmra.mrb[28].mxu0 %vm842_vm2, %v2503_v26 }
 0x608   : > { %v2505_v49 = vpop.f32.mrb[61].mxu1 }
 0x609   : > { %v2506_v54 = vadd.f32 %v2505_v49, %v2504_v47 }
 0x60b   : > { %2651 = vmatprep.mubr.msk.f32.mxu1 %vm842_vm2, %v2506_v54 }
 0x60c   : > { %v2507_v57 = vpop.f32.mrb[62].mxu1 }
 0x60d   : > { %v2508_v31 = vpop.f32.mrb[63].mxu1 }
 0x60e   : > { %v2509_v60 = vadd.f32 %v2508_v31, %v2507_v57 }
 0x610   : > { %2652 = vmatmul.mubr.msk.f32.vlgmr.msra.gmra.mrb[64].mxu1 %vm842_vm2, %v2509_v60 }
 0x6ca   : > { %v2644_v9 = vpop.f32.mrb[24].mxu0 }
 0x6cb   : > { %v4266_v11 = vadd.f32 %v2644_v9, %v1505_v6  ;;  %v1596_v14 = vpop.f32.mrb[25].mxu0 }
 0x6cc   : > { %v4268_v17 = vadd.f32 %v1596_v14, %v1505_v6 }
 0x6cd   : > { %v1646_v50 = vsel %vm842_vm2, %v4266_v11, 0.0 }
 0x6ce   : > { %1647 = vadd.xlane.f32.xlu1 %v1646_v50  ;;  %v1643_v19 = vsel %vm842_vm2, %v4268_v17, 0.0 }
 0x6cf   : > { %1644 = vadd.xlane.f32.xlu0 %v1643_v19 }
 0x6d2   : > { %v2647_v25 = vpop.f32.mrb[26].mxu0 }
 0x6d3   : > { %v1606_v0 = vpop.f32.mrb[27].mxu0  ;;  %v4276_v39 = vadd.f32 %v2647_v25, %v1505_v6 }
 0x6d4   : > { %v4274_v27 = vadd.f32 %v1606_v0, %v1505_v6 }
 0x6d5   : > { %v1652_v52 = vsel %vm842_vm2, %v4276_v39, 0.0 }
 0x6d6   : > { %v1649_v42 = vsel %vm842_vm2, %v4274_v27, 0.0 }
 0x6d7   : > { %1650 = vadd.xlane.f32.xlu0 %v1649_v42 }
 0x6da   : > { %v2650_v48 = vpop.f32.mrb[28].mxu0 }
 0x6db   : > { %v4282_v2 = vadd.f32 %v2650_v48, %v1505_v6  ;;  %v1616_v43 = vpop.f32.mrb[29].mxu0  ;;  %1653 = vadd.xlane.f32.xlu0 %v1652_v52 }
 0x6dc   : > { %v4284_v5 = vadd.f32 %v1616_v43, %v1505_v6  ;;  %v1750_v43 = vsub.s32 1, %v4257_v23 }
 0x6dd   : > { %v1658_v63 = vsel %vm842_vm2, %v4282_v2, 0.0 }
 0x6de   : > { %v1655_v20 = vsel %vm842_vm2, %v4284_v5, 0.0 }
 0x6df   : > { %1656 = vadd.xlane.f32.xlu1 %v1655_v20  ;;  %1659 = vadd.xlane.f32.xlu0 %v1658_v63  ;;  %v1762_v20 = vsub.s32 2, %v4257_v23 }
 0x6e3   : > { %v2653_v30 = vpop.f32.mrb[64].mxu1 }
 0x6e4   : > { %v4290_v56 = vadd.f32 %v2653_v30, %v1505_v6  ;;  %v1626_v4 = vpop.f32.mrb[65].mxu1 }
 0x6e5   : > { %v4292_v12 = vadd.f32 %v1626_v4, %v1505_v6 }
 0x6e6   : > { %v1664_v34 = vsel %vm842_vm2, %v4290_v56, 0.0 }
 0x6e7   : > { %1665 = vadd.xlane.f32.xlu0 %v1664_v34  ;;  %v1661_v59 = vsel %vm842_vm2, %v4292_v12, 0.0  ;;  %v4349_v34 = vrot.slane %v4263_v3, %v1750_v43 }
 0x6e8   : > { %1662 = vadd.xlane.f32.xlu1 %v1661_v59 }
 0x75b   : > { %v1648_v1 = vpop.xlane.xlu1 %1647 }
 0x75c   : > { %v1669_v41 = vmul.f32 0.03125, %v1648_v1  ;;  %v1645_v18 = vpop.xlane.xlu0 %1644 }
 0x75d   : > { %v1668_v16 = vmul.f32 0.03125, %v1645_v18  ;;  %v4352_v18 = vrot.slane %v4263_v3, %v1762_v20 }
 0x75e   : > { %v4299_v28 = vsub.f32 %v4266_v11, %v1669_v41 }
 0x75f   : > { %v4302_v51 = vsub.f32 %v4268_v17, %v1668_v16 }
 0x760   : > { %v1685_v53 = vmul.f32 %v4299_v28, %v4299_v28 }
 0x761   : > { %v1684_v22 = vmul.f32 %v4302_v51, %v4302_v51 }
 0x762   : > { %v1695_v35 = vsel %vm842_vm2, %v1685_v53, 0.0 }
 0x763   : > { %1696 = vadd.xlane.f32.xlu0 %v1695_v35  ;;  %v1692_v32 = vsel %vm842_vm2, %v1684_v22, 0.0 }
 0x764   : > { %1693 = vadd.xlane.f32.xlu1 %v1692_v32  ;;  %v1651_v44 = vpop.xlane.xlu0 %1650 }
 0x765   : > { %v1670_v61 = vmul.f32 0.03125, %v1651_v44 }
 0x767   : > { %v4311_v24 = vsub.f32 %v4274_v27, %v1670_v61 }
 0x768   : > { %v1654_v58 = vpop.xlane.xlu0 %1653 }
 0x769   : > { %v1671_v55 = vmul.f32 0.03125, %v1654_v58  ;;  %v1686_v46 = vmul.f32 %v4311_v24, %v4311_v24 }
 0x76b   : > { %v4316_v13 = vsub.f32 %v4276_v39, %v1671_v55  ;;  %v1698_v45 = vsel %vm842_vm2, %v1686_v46, 0.0 }
 0x76c   : > { %v1657_v40 = vpop.xlane.xlu1 %1656  ;;  %1699 = vadd.xlane.f32.xlu1 %v1698_v45  ;;  %v1660_v10 = vpop.xlane.xlu0 %1659 }
 0x76d   : > { %v1672_v29 = vmul.f32 0.03125, %v1657_v40  ;;  %v1673_v38 = vmul.f32 0.03125, %v1660_v10  ;;  %v1687_v36 = vmul.f32 %v4316_v13, %v4316_v13 }
 0x76f   : > { %v4322_v15 = vsub.f32 %v4284_v5, %v1672_v29  ;;  %v4325_v21 = vsub.f32 %v4282_v2, %v1673_v38  ;;  %v1701_v7 = vsel %vm842_vm2, %v1687_v36, 0.0 }
 0x770   : > { %1702 = vadd.xlane.f32.xlu0 %v1701_v7 }
 0x771   : > { %v1688_v8 = vmul.f32 %v4322_v15, %v4322_v15  ;;  %v1689_v33 = vmul.f32 %v4325_v21, %v4325_v21 }
 0x773   : > { %v1704_v47 = vsel %vm842_vm2, %v1688_v8, 0.0  ;;  %v1707_v49 = vsel %vm842_vm2, %v1689_v33, 0.0 }
 0x774   : > { %v1666_v26 = vpop.xlane.xlu0 %1665  ;;  %1705 = vadd.xlane.f32.xlu1 %v1704_v47  ;;  %1708 = vadd.xlane.f32.xlu0 %v1707_v49 }
 0x775   : > { %v1675_v54 = vmul.f32 0.03125, %v1666_v26  ;;  %v1663_v57 = vpop.xlane.xlu1 %1662 }
 0x776   : > { %v1674_v31 = vmul.f32 0.03125, %v1663_v57 }
 0x777   : > { %v4335_v60 = vsub.f32 %v4290_v56, %v1675_v54 }
 0x778   : > { %v4338_v37 = vsub.f32 %v4292_v12, %v1674_v31 }
 0x779   : > { %v1691_v62 = vmul.f32 %v4335_v60, %v4335_v60 }
 0x77a   : > { %v1690_v6 = vmul.f32 %v4338_v37, %v4338_v37 }
 0x77b   : > { %v1713_v9 = vsel %vm842_vm2, %v1691_v62, 0.0 }
 0x77c   : > { %1714 = vadd.xlane.f32.xlu0 %v1713_v9  ;;  %v1710_v14 = vsel %vm842_vm2, %v1690_v6, 0.0 }
 0x77d   : > { %1711 = vadd.xlane.f32.xlu1 %v1710_v14 }
 0x7f0   : > { %v1697_v50 = vpop.xlane.xlu0 %1696 }
 0x7f1   : > { %v1717_v19 = vmul.f32 0.03125, %v1697_v50  ;;  %v1694_v25 = vpop.xlane.xlu1 %1693 }
 0x7f2   : > { %v1716_v0 = vmul.f32 0.03125, %v1694_v25 }
 0x7f3   : > { %v1725_v42 = vadd.f32 1e-05, %v1717_v19 }
 0x7f4   : > { %v1724_v48 = vadd.f32 1e-05, %v1716_v0 }
 0x7f5   : > { %3085 = vrsqrt.f32 %v1725_v42 }
 0x7f6   : > { %3087 = vrsqrt.f32 %v1724_v48 }
 0x7f9   : > { %v1700_v52 = vpop.xlane.xlu1 %1699 }
 0x7fa   : > { %v1718_v63 = vmul.f32 0.03125, %v1700_v52 }
 0x7fc   : > { %v1726_v30 = vadd.f32 1e-05, %v1718_v63  ;;  %v1636_v63 = vmax.f32 %v4266_v11, 0.0 }
 0x7fd   : > { %v1703_v4 = vpop.xlane.xlu0 %1702 }
 0x7fe   : > { %3089 = vrsqrt.f32 %v1726_v30  ;;  %v1719_v59 = vmul.f32 0.03125, %v1703_v4  ;;  %v1635_v30 = vmax.f32 %v4268_v17, 0.0  ;;  %v1639_v17 = vmax.f32 %v4284_v5, 0.0 }
 0x7ff   : > { %v3086_v1 = vpop.eup %3085 }
 0x800   : > { %v3088_v41 = vpop.eup %3087  ;;  %v1727_v16 = vadd.f32 1e-05, %v1719_v59  ;;  %v1741_v53 = vmul.f32 %v3086_v1, %v4299_v28  ;;  %v1637_v59 = vmax.f32 %v4274_v27, 0.0  ;;  %v1642_v27 = vmax.f32 %v4290_v56, 0.0 }
 0x801   : > { %v1706_v22 = vpop.xlane.xlu1 %1705  ;;  %v1709_v35 = vpop.xlane.xlu0 %1708  ;;  %v1740_v32 = vmul.f32 %v3088_v41, %v4302_v51 }
 0x802   : > { %3091 = vrsqrt.f32 %v1727_v16  ;;  %v1720_v44 = vmul.f32 0.03125, %v1706_v22  ;;  %v1721_v61 = vmul.f32 0.03125, %v1709_v35  ;;  %v1753_v58 = vmul.f32 %v4349_v34, %v1741_v53 }
 0x803   : > { %v1752_v55 = vmul.f32 %v4349_v34, %v1740_v32  ;;  %v1638_v16 = vmax.f32 %v4276_v39, 0.0  ;;  %v1640_v22 = vmax.f32 %v4282_v2, 0.0  ;;  %v1641_v39 = vmax.f32 %v4292_v12, 0.0 }
 0x804   : > { %v1728_v46 = vadd.f32 1e-05, %v1720_v44  ;;  %v1729_v45 = vadd.f32 1e-05, %v1721_v61  ;;  %v1765_v40 = vadd.f32 %v4352_v18, %v1753_v58 }
 0x805   : > { %v1764_v10 = vadd.f32 %v4352_v18, %v1752_v55 }
 0x806   : > { %3093 = vrsqrt.f32 %v1728_v46  ;;  %1782 = vrot.lane.b32.xlu0 %v1765_v40, %s3182_s21 }
 0x807   : > { %3095 = vrsqrt.f32 %v1729_v45  ;;  %1780 = vrot.lane.b32.xlu1 %v1764_v10, %s3182_s21 }
 0x808   : > { %v3090_v28 = vpop.eup %3089 }
 0x809   : > { %v1715_v51 = vpop.xlane.xlu0 %1714  ;;  %v1742_v36 = vmul.f32 %v3090_v28, %v4311_v24 }
 0x80a   : > { %v1723_v29 = vmul.f32 0.03125, %v1715_v51  ;;  %v1712_v38 = vpop.xlane.xlu1 %1711 }
 0x80b   : > { %v1722_v7 = vmul.f32 0.03125, %v1712_v38  ;;  %v1754_v33 = vmul.f32 %v4349_v34, %v1742_v36 }
 0x80c   : > { %v1731_v8 = vadd.f32 1e-05, %v1723_v29  ;;  %v3092_v26 = vpop.eup %3091 }
 0x80d   : > { %v1730_v47 = vadd.f32 1e-05, %v1722_v7  ;;  %v1766_v49 = vadd.f32 %v4352_v18, %v1754_v33  ;;  %v1743_v54 = vmul.f32 %v3092_v26, %v4316_v13 }
 0x80e   : > { %3097 = vrsqrt.f32 %v1731_v8 }
 0x80f   : > { %3099 = vrsqrt.f32 %v1730_v47  ;;  %1784 = vrot.lane.b32.xlu1 %v1766_v49, %s3182_s21  ;;  %v1755_v57 = vmul.f32 %v4349_v34, %v1743_v54 }
 0x810   : > { %v3094_v31 = vpop.eup %3093 }
 0x811   : > { %v3096_v62 = vpop.eup %3095  ;;  %v1767_v24 = vadd.f32 %v4352_v18, %v1755_v57  ;;  %v1744_v6 = vmul.f32 %v3094_v31, %v4322_v15 }
 0x812   : > { %v1745_v9 = vmul.f32 %v3096_v62, %v4325_v21 }
 0x813   : > { %1786 = vrot.lane.b32.xlu1 %v1767_v24, %s3182_s21  ;;  %v1756_v14 = vmul.f32 %v4349_v34, %v1744_v6 }
 0x814   : > { %v1757_v50 = vmul.f32 %v4349_v34, %v1745_v9 }
 0x815   : > { %v1768_v13 = vadd.f32 %v4352_v18, %v1756_v14 }
 0x816   : > { %v1769_v19 = vadd.f32 %v4352_v18, %v1757_v50 }
 0x817   : > { %1788 = vrot.lane.b32.xlu0 %v1768_v13, %s3182_s21 }
 0x818   : > { %v3098_v25 = vpop.eup %3097  ;;  %1790 = vrot.lane.b32.xlu1 %v1769_v19, %s3182_s21 }
 0x819   : > { %v3100_v0 = vpop.eup %3099  ;;  %v1747_v15 = vmul.f32 %v3098_v25, %v4335_v60 }
 0x81a   : > { %v1746_v21 = vmul.f32 %v3100_v0, %v4338_v37 }
 0x81b   : > { %v1759_v42 = vmul.f32 %v4349_v34, %v1747_v15 }
 0x81c   : > { %v1758_v48 = vmul.f32 %v4349_v34, %v1746_v21 }
 0x81d   : > { %v1771_v52 = vadd.f32 %v4352_v18, %v1759_v42 }
 0x81e   : > { %v1770_v43 = vadd.f32 %v4352_v18, %v1758_v48 }
 0x81f   : > { %1794 = vrot.lane.b32.xlu1 %v1771_v52, %s3182_s21 }
 0x820   : > { %1792 = vrot.lane.b32.xlu0 %v1770_v43, %s3182_s21 }
 0x878   : > { %v1783_v20 = vpop.permute.xlu0 %1782 }
 0x879   : > { %v1805_v60 = vadd.f32 %v1783_v20, %v1636_v63  ;;  %v1781_v4 = vpop.permute.xlu1 %1780 }
 0x87a   : > { %v1804_v37 = vadd.f32 %v1781_v4, %v1635_v30 }
 0x87b   : > { %1822 = vrot.lane.b32.xlu1 %v1805_v60, %s3181_s17 }
 0x87c   : > { %1820 = vrot.lane.b32.xlu0 %v1804_v37, %s3181_s17 }
 0x881   : > { %v1785_v1 = vpop.permute.xlu1 %1784 }
 0x882   : > { %v1806_v41 = vadd.f32 %v1785_v1, %v1637_v59 }
 0x884   : > { %1824 = vrot.lane.b32.xlu0 %v1806_v41, %s3181_s17 }
 0x885   : > { %v1787_v53 = vpop.permute.xlu1 %1786 }
 0x886   : > { %v1807_v11 = vadd.f32 %v1787_v53, %v1638_v16 }
 0x888   : > { %1826 = vrot.lane.b32.xlu1 %v1807_v11, %s3181_s17 }
 0x889   : > { %v1789_v35 = vpop.permute.xlu0 %1788 }
 0x88a   : > { %v1791_v32 = vpop.permute.xlu1 %1790  ;;  %v1808_v44 = vadd.f32 %v1789_v35, %v1639_v17 }
 0x88b   : > { %v1809_v61 = vadd.f32 %v1791_v32, %v1640_v22 }
 0x88c   : > { %1828 = vrot.lane.b32.xlu0 %v1808_v44, %s3181_s17 }
 0x88d   : > { %1830 = vrot.lane.b32.xlu1 %v1809_v61, %s3181_s17 }
 0x891   : > { %v1795_v58 = vpop.permute.xlu1 %1794 }
 0x892   : > { %v4400_v55 = vadd.f32 %v1795_v58, %v1642_v27  ;;  %v1793_v46 = vpop.permute.xlu0 %1792 }
 0x893   : > { %v1810_v45 = vadd.f32 %v1793_v46, %v1641_v39 }
 0x894   : > { %1834 = vrot.lane.b32.xlu1 %v4400_v55, %s3181_s17 }
 0x895   : > { %1832 = vrot.lane.b32.xlu0 %v1810_v45, %s3181_s17 }
 0x8ed   : > { %v1823_v2 = vpop.permute.xlu1 %1822 }
 0x8ee   : > { %v1821_v5 = vpop.permute.xlu0 %1820  ;;  %v1847_v40 = vsel %vm842_vm2, %v1823_v2, 0.0 }
 0x8ef   : > { %1848 = vadd.xlane.f32.xlu1 %v1847_v40  ;;  %v1844_v10 = vsel %vm842_vm2, %v1821_v5, 0.0 }
 0x8f0   : > { %1845 = vadd.xlane.f32.xlu0 %v1844_v10 }
 0x8f6   : > { %v1825_v56 = vpop.permute.xlu0 %1824 }
 0x8f7   : > { %v1850_v12 = vsel %vm842_vm2, %v1825_v56, 0.0  ;;  %v321_v56 = vld [vmem:[%s4559_s1 + $0x800] sm:$0xff] }
 0x8f8   : > { %1851 = vadd.xlane.f32.xlu0 %v1850_v12  ;;  %v322_v12 = vld [vmem:[%s4559_s1 + $0x810] sm:$0xff] }
 0x8fa   : > { %v1827_v28 = vpop.permute.xlu1 %1826 }
 0x8fb   : > { %v1853_v51 = vsel %vm842_vm2, %v1827_v28, 0.0  ;;  %v323_v28 = vld [vmem:[%s4559_s1 + $0x820] sm:$0xff] }
 0x8fc   : > { %1854 = vadd.xlane.f32.xlu0 %v1853_v51  ;;  %v2866_v51 = vpack.c.bf16 %v322_v12, %v321_v56 }
 0x8fe   : > { %v1829_v29 = vpop.permute.xlu0 %1828  ;;  %2867 = vmatprep.subr.bf16.mxu0 %v2866_v51 }
 0x8ff   : > { %v1831_v38 = vpop.permute.xlu1 %1830  ;;  %v1856_v36 = vsel %vm842_vm2, %v1829_v29, 0.0  ;;  %2869 = vmatpush3.bf16.msra.mxu0 %v2866_v51 }
 0x900   : > { %v1859_v7 = vsel %vm842_vm2, %v1831_v38, 0.0  ;;  %1857 = vadd.xlane.f32.xlu1 %v1856_v36 }
 0x901   : > { %1860 = vadd.xlane.f32.xlu0 %v1859_v7 }
 0x906   : > { %v1835_v8 = vpop.permute.xlu1 %1834 }
 0x907   : > { %v1833_v33 = vpop.permute.xlu0 %1832  ;;  %v1865_v26 = vsel %vm842_vm2, %v1835_v8, 0.0 }
 0x908   : > { %1866 = vadd.xlane.f32.xlu0 %v1865_v26  ;;  %v1862_v47 = vsel %vm842_vm2, %v1833_v33, 0.0 }
 0x909   : > { %1863 = vadd.xlane.f32.xlu1 %v1862_v47 }
 0x97c   : > { %v1849_v49 = vpop.xlane.xlu1 %1848 }
 0x97d   : > { %v1869_v54 = vmul.f32 0.03125, %v1849_v49  ;;  %v1846_v57 = vpop.xlane.xlu0 %1845 }
 0x97e   : > { %v1868_v31 = vmul.f32 0.03125, %v1846_v57 }
 0x97f   : > { %v4413_v62 = vsub.f32 %v1805_v60, %v1869_v54 }
 0x980   : > { %v4415_v24 = vsub.f32 %v1804_v37, %v1868_v31 }
 0x981   : > { %v1885_v6 = vmul.f32 %v4413_v62, %v4413_v62 }
 0x982   : > { %v1884_v9 = vmul.f32 %v4415_v24, %v4415_v24 }
 0x983   : > { %1902 = vrot.lane.b32.xlu0 %v1885_v6, %s3181_s17 }
 0x984   : > { %1900 = vrot.lane.b32.xlu1 %v1884_v9, %s3181_s17 }
 0x985   : > { %v1852_v14 = vpop.xlane.xlu0 %1851 }
 0x986   : > { %v1870_v50 = vmul.f32 0.03125, %v1852_v14 }
 0x988   : > { %v4423_v13 = vsub.f32 %v1806_v41, %v1870_v50 }
 0x989   : > { %v1855_v19 = vpop.xlane.xlu0 %1854 }
 0x98a   : > { %v1871_v25 = vmul.f32 0.03125, %v1855_v19  ;;  %v1886_v0 = vmul.f32 %v4423_v13, %v4423_v13 }
 0x98c   : > { %v4427_v15 = vsub.f32 %v1807_v11, %v1871_v25  ;;  %1904 = vrot.lane.b32.xlu1 %v1886_v0, %s3181_s17 }
 0x98d   : > { %v1858_v21 = vpop.xlane.xlu1 %1857 }
 0x98e   : > { %v1872_v42 = vmul.f32 0.03125, %v1858_v21  ;;  %v1861_v48 = vpop.xlane.xlu0 %1860  ;;  %v1887_v52 = vmul.f32 %v4427_v15, %v4427_v15 }
 0x98f   : > { %v1873_v43 = vmul.f32 0.03125, %v1861_v48 }
 0x990   : > { %v4432_v63 = vsub.f32 %v1808_v44, %v1872_v42  ;;  %1906 = vrot.lane.b32.xlu1 %v1887_v52, %s3181_s17 }
 0x991   : > { %v4435_v20 = vsub.f32 %v1809_v61, %v1873_v43 }
 0x992   : > { %v1888_v30 = vmul.f32 %v4432_v63, %v4432_v63 }
 0x993   : > { %v1889_v60 = vmul.f32 %v4435_v20, %v4435_v20 }
 0x994   : > { %1908 = vrot.lane.b32.xlu0 %v1888_v30, %s3181_s17 }
 0x995   : > { %v1867_v4 = vpop.xlane.xlu0 %1866  ;;  %1910 = vrot.lane.b32.xlu1 %v1889_v60, %s3181_s17 }
 0x996   : > { %v1875_v37 = vmul.f32 0.03125, %v1867_v4  ;;  %v1864_v59 = vpop.xlane.xlu1 %1863 }
 0x997   : > { %v1874_v1 = vmul.f32 0.03125, %v1864_v59 }
 0x998   : > { %v4444_v41 = vsub.f32 %v4400_v55, %v1875_v37 }
 0x999   : > { %v4446_v16 = vsub.f32 %v1810_v45, %v1874_v1 }
 0x99a   : > { %v1891_v53 = vmul.f32 %v4444_v41, %v4444_v41 }
 0x99b   : > { %v1890_v11 = vmul.f32 %v4446_v16, %v4446_v16 }
 0x99c   : > { %1914 = vrot.lane.b32.xlu1 %v1891_v53, %s3181_s17 }
 0x99d   : > { %1912 = vrot.lane.b32.xlu0 %v1890_v11, %s3181_s17 }
 0x9f5   : > { %v1903_v17 = vpop.permute.xlu0 %1902 }
 0x9f6   : > { %v1901_v22 = vpop.permute.xlu1 %1900  ;;  %v1927_v35 = vsel %vm842_vm2, %v1903_v17, 0.0 }
 0x9f7   : > { %1928 = vadd.xlane.f32.xlu1 %v1927_v35  ;;  %v1924_v32 = vsel %vm842_vm2, %v1901_v22, 0.0 }
 0x9f8   : > { %1925 = vadd.xlane.f32.xlu0 %v1924_v32 }
 0x9fe   : > { %v1905_v44 = vpop.permute.xlu1 %1904 }
 0x9ff   : > { %v1930_v39 = vsel %vm842_vm2, %v1905_v44, 0.0 }
 0xa02   : > { %v1907_v61 = vpop.permute.xlu1 %1906 }
 0xa03   : > { %v1933_v27 = vsel %vm842_vm2, %v1907_v61, 0.0 }
 0xa04   : > { %1934 = vadd.xlane.f32.xlu0 %v1933_v27 }
 0xa06   : > { %v1909_v58 = vpop.permute.xlu0 %1908 }
 0xa07   : > { %v1936_v55 = vsel %vm842_vm2, %v1909_v58, 0.0  ;;  %v1911_v46 = vpop.permute.xlu1 %1910 }
 0xa08   : > { %1931 = vadd.xlane.f32.xlu0 %v1930_v39  ;;  %1937 = vadd.xlane.f32.xlu1 %v1936_v55  ;;  %v1939_v45 = vsel %vm842_vm2, %v1911_v46, 0.0 }
 0xa0c   : > { %1940 = vadd.xlane.f32.xlu0 %v1939_v45 }
 0xa0e   : > { %v1915_v2 = vpop.permute.xlu1 %1914 }
 0xa0f   : > { %v1913_v5 = vpop.permute.xlu0 %1912  ;;  %v1945_v40 = vsel %vm842_vm2, %v1915_v2, 0.0 }
 0xa10   : > { %v1942_v10 = vsel %vm842_vm2, %v1913_v5, 0.0  ;;  %1946 = vadd.xlane.f32.xlu0 %v1945_v40 }
 0xa11   : > { %1943 = vadd.xlane.f32.xlu1 %v1942_v10 }
 0xa22   : > { %1981 = vrot.lane.b32.xlu1 %v4349_v34, %s3182_s21  ;;  %v324_v34 = vld [vmem:[%s4559_s1 + $0x830] sm:$0xff] }
 0xa23   : > { %v2870_v29 = vpack.c.bf16 %v324_v34, %v323_v28 }
 0xa25   : > { %2871 = vmatprep.subr.bf16.mxu0 %v2870_v29 }
 0xa26   : > { %1993 = vrot.lane.b32.xlu0 %v4352_v18, %s3182_s21  ;;  %2873 = vmatpush3.bf16.msra.mxu0 %v2870_v29  ;;  %s3121_s21 = sshll.u32 %s3183_s16, 4  ;;  %s3122_s21 = int_to_ptr.vmem [resolvable:$false] %s3121_s21 }
 0xa27   : > { %s3123_s22 = scalar_lea.vmem %s3122_s21, 2048 }
 0xa84   : > { %v1929_v38 = vpop.xlane.xlu1 %1928 }
 0xa85   : > { %v1926_v18 = vpop.xlane.xlu0 %1925  ;;  %v1949_v7 = vmul.f32 0.03125, %v1929_v38 }
 0xa86   : > { %v1948_v36 = vmul.f32 0.03125, %v1926_v18 }
 0xa87   : > { %v1957_v33 = vadd.f32 1e-05, %v1949_v7 }
 0xa88   : > { %v1956_v8 = vadd.f32 1e-05, %v1948_v36 }
 0xa8a   : > { %3101 = vrsqrt.f32 %v1956_v8  ;;  %v2006_v8 = vsub.s32 3, %v4257_v23 }
 0xa8b   : > { %3103 = vrsqrt.f32 %v1957_v33 }
 0xa8c   : > { %v2007_v33 = vrot.slane %v4263_v3, %v2006_v8 }
 0xa91   : > { %v1935_v26 = vpop.xlane.xlu0 %1934 }
 0xa92   : > { %v1951_v47 = vmul.f32 0.03125, %v1935_v26 }
 0xa94   : > { %v1959_v49 = vadd.f32 1e-05, %v1951_v47  ;;  %v3102_v0 = vpop.eup %3101 }
 0xa95   : > { %v1938_v54 = vpop.xlane.xlu1 %1937  ;;  %v1932_v57 = vpop.xlane.xlu0 %1931  ;;  %v1972_v4 = vmul.f32 %v3102_v0, %v4415_v24 }
 0xa96   : > { %v1952_v31 = vmul.f32 0.03125, %v1938_v54  ;;  %v1950_v6 = vmul.f32 0.03125, %v1932_v57  ;;  %3105 = vrsqrt.f32 %v1959_v49  ;;  %v3104_v43 = vpop.eup %3103 }
 0xa97   : > { %v1973_v11 = vmul.f32 %v3104_v43, %v4413_v62 }
 0xa98   : > { %v1960_v9 = vadd.f32 1e-05, %v1952_v31  ;;  %v1958_v14 = vadd.f32 1e-05, %v1950_v6 }
 0xa99   : > { %v1941_v50 = vpop.xlane.xlu0 %1940 }
 0xa9a   : > { %3107 = vrsqrt.f32 %v1960_v9  ;;  %v1953_v19 = vmul.f32 0.03125, %v1941_v50 }
 0xa9b   : > { %3109 = vrsqrt.f32 %v1958_v14 }
 0xa9c   : > { %v1961_v25 = vadd.f32 1e-05, %v1953_v19 }
 0xa9d   : > { %v1947_v42 = vpop.xlane.xlu0 %1946 }
 0xa9e   : > { %v1944_v21 = vpop.xlane.xlu1 %1943  ;;  %3111 = vrsqrt.f32 %v1961_v25  ;;  %v1955_v52 = vmul.f32 0.03125, %v1947_v42 }
 0xa9f   : > { %v1954_v48 = vmul.f32 0.03125, %v1944_v21 }
 0xaa0   : > { %v1963_v60 = vadd.f32 1e-05, %v1955_v52  ;;  %v3106_v37 = vpop.eup %3105 }
 0xaa1   : > { %v1962_v30 = vadd.f32 1e-05, %v1954_v48  ;;  %v1994_v1 = vpop.permute.xlu0 %1993  ;;  %v1975_v32 = vmul.f32 %v3106_v37, %v4427_v15 }
 0xaa2   : > { %v1982_v59 = vpop.permute.xlu1 %1981 }
 0xaa3   : > { %3113 = vrsqrt.f32 %v1962_v30  ;;  %v1984_v53 = vmul.f32 %v1982_v59, %v1972_v4  ;;  %v1985_v35 = vmul.f32 %v1982_v59, %v1973_v11  ;;  %v1987_v55 = vmul.f32 %v1982_v59, %v1975_v32 }
 0xaa4   : > { %3115 = vrsqrt.f32 %v1963_v60  ;;  %v3108_v17 = vpop.eup %3107 }
 0xaa5   : > { %v1996_v22 = vadd.f32 %v1994_v1, %v1984_v53  ;;  %v3110_v44 = vpop.eup %3109  ;;  %v1976_v24 = vmul.f32 %v3108_v17, %v4432_v63  ;;  %v1997_v58 = vadd.f32 %v1994_v1, %v1985_v35  ;;  %v1999_v15 = vadd.f32 %v1994_v1, %v1987_v55 }
 0xaa6   : > { %v1974_v61 = vmul.f32 %v3110_v44, %v4423_v13 }
 0xaa7   : > { %2016 = vrot.lane.b32.xlu1 %v1996_v22, %s3181_s17  ;;  %v1988_v45 = vmul.f32 %v1982_v59, %v1976_v24 }
 0xaa8   : > { %v3112_v27 = vpop.eup %3111  ;;  %v1986_v39 = vmul.f32 %v1982_v59, %v1974_v61 }
 0xaa9   : > { %v1977_v46 = vmul.f32 %v3112_v27, %v4435_v20  ;;  %v2000_v63 = vadd.f32 %v1994_v1, %v1988_v45 }
 0xaaa   : > { %v1998_v62 = vadd.f32 %v1994_v1, %v1986_v39 }
 0xaab   : > { %2018 = vrot.lane.b32.xlu1 %v1997_v58, %s3181_s17  ;;  %v1989_v5 = vmul.f32 %v1982_v59, %v1977_v46 }
 0xaac   : > { %2020 = vrot.lane.b32.xlu0 %v1998_v62, %s3181_s17 }
 0xaad   : > { %v3114_v2 = vpop.eup %3113  ;;  %v2001_v20 = vadd.f32 %v1994_v1, %v1989_v5 }
 0xaae   : > { %v3116_v40 = vpop.eup %3115  ;;  %v1978_v13 = vmul.f32 %v3114_v2, %v4446_v16 }
 0xaaf   : > { %2022 = vrot.lane.b32.xlu1 %v1999_v15, %s3181_s17  ;;  %v1979_v10 = vmul.f32 %v3116_v40, %v4444_v41 }
 0xab0   : > { %v1990_v56 = vmul.f32 %v1982_v59, %v1978_v13  ;;  %2024 = vrot.lane.b32.xlu0 %v2000_v63, %s3181_s17 }
 0xab1   : > { %v1991_v12 = vmul.f32 %v1982_v59, %v1979_v10 }
 0xab2   : > { %v2002_v28 = vadd.f32 %v1994_v1, %v1990_v56 }
 0xab3   : > { %2026 = vrot.lane.b32.xlu1 %v2001_v20, %s3181_s17  ;;  %v2003_v51 = vadd.f32 %v1994_v1, %v1991_v12 }
 0xab4   : > { %2028 = vrot.lane.b32.xlu0 %v2002_v28, %s3181_s17 }
 0xab7   : > { %2030 = vrot.lane.b32.xlu1 %v2003_v51, %s3181_s17  ;;  %s135_s17 = sand.u32 1, %s3171_s10  }
 0xab8   : > { %s2241_s30 = sshll.u32 %s135_s17, 6  ;;  %s4517_s13 = scalar_lea.sflag [#allocation3], %s135_s17 }
 0xab9   : > { %s137_s3 = scalar_lea.vmem [#allocation2], %s2241_s30 }
 0xaba   : > { %s2175_s5 = sshll.u32 %s137_s3, 4  ;;  %s4513_s5 = int_to_ptr.vmem [resolvable:$true] %s2175_s5 }
 0xabb   : > { %s3117_s14 = scalar_lea.vmem %s4513_s5, 1024  ;;  %p3124_p0 = scmp.lt.s32.totalorder %s4513_s5, %s3122_s21 }
 0xabc   : > { %p3118_p11 = scmp.ne.s32.totalorder %s4513_s5, %s3117_s14  ;;  %p3125_p1 = scmp.lt.s32.totalorder %s3123_s22, %s3117_s14 }
 0xabe   : > { %p3119_p12 = pnand %p3118_p11, %p3239_p5  ;;  %p3126_p2 = por %p3125_p1, %p3124_p0 }
 0xac0   : > { %p3120_p13 = pneg %p3119_p12 }
 0xac2   : > { %p3127_p3 = pnand %p3126_p2, %p3120_p13 }
 0xb19   : > { %v2017_v34 = vpop.permute.xlu1 %2016 }
 0xb1a   : > { %2662 = vmatprep.mubr.msk.f32.mxu0 %vm842_vm2, %v2017_v34 }
 0xb1d   : > { %v2019_v16 = vpop.permute.xlu1 %2018 }
 0xb1e   : > { %2663 = vmatmul.mubr.msk.f32.vlgmr.msra.gmra.mrb[30].mxu0 %vm842_vm2, %v2019_v16  ;;  %v2021_v41 = vpop.permute.xlu0 %2020 }
 0xb1f   : > { %2665 = vmatprep.mubr.msk.f32.mxu0 %vm842_vm2, %v2021_v41 }
 0xb21   : > { %v2023_v29 = vpop.permute.xlu1 %2022 }
 0xb22   : > { %2666 = vmatmul.mubr.msk.f32.gmra.mrb[32].mxu0 %vm842_vm2, %v2023_v29  ;;  %v2025_v18 = vpop.permute.xlu0 %2024 }
 0xb23   : > { %2668 = vmatprep.mubr.msk.f32.mxu0 %vm842_vm2, %v2025_v18 }
 0xb25   : > { %v2027_v38 = vpop.permute.xlu1 %2026 }
 0xb26   : > { %2669 = vmatmul.mubr.msk.f32.gmra.mrb[34].mxu0 %vm842_vm2, %v2027_v38  ;;  %v2029_v36 = vpop.permute.xlu0 %2028 }
 0xb27   : > { %2671 = vmatprep.mubr.msk.f32.mxu0 %vm842_vm2, %v2029_v36 }
 0xb29   : > { %v2031_v7 = vpop.permute.xlu1 %2030 }
 0xb2a   : > { %2672 = vmatmul.mubr.msk.f32.gmra.mrb[36].mxu0 %vm842_vm2, %v2031_v7 }
 0xbf1   : > { %v2664_v26 = vpop.f32.mrb[30].mxu0 }
 0xbf2   : > { %v2120_v47 = vadd.f32 %v2664_v26, %v2007_v33  ;;  %v2114_v49 = vpop.f32.mrb[31].mxu0 }
 0xbf3   : > { %v2115_v54 = vadd.f32 %v2114_v49, %v2007_v33 }
 0xbf4   : > { %2154 = vst [vmem:[%s137_s3 + $0x8] sm:$0xff] %v2120_v47 }
 0xbf5   : > { %2153 = vst [vmem:[%s137_s3] sm:$0xff] %v2115_v54  ;;  %v2667_v57 = vpop.f32.mrb[32].mxu0 }
 0xbf6   : > { %v2130_v31 = vadd.f32 %v2667_v57, %v2007_v33  ;;  %v2124_v6 = vpop.f32.mrb[33].mxu0 }
 0xbf7   : > { %v2125_v9 = vadd.f32 %v2124_v6, %v2007_v33 }
 0xbf8   : > { %2156 = vst [vmem:[%s137_s3 + $0x18] sm:$0xff] %v2130_v31 }
 0xbf9   : > { %2155 = vst [vmem:[%s137_s3 + $0x10] sm:$0xff] %v2125_v9  ;;  %v2670_v23 = vpop.f32.mrb[34].mxu0 }
 0xbfa   : > { %v2140_v14 = vadd.f32 %v2670_v23, %v2007_v33  ;;  %v2134_v50 = vpop.f32.mrb[35].mxu0 }
 0xbfb   : > { %v2135_v19 = vadd.f32 %v2134_v50, %v2007_v33 }
 0xbfc   : > { %2158 = vst [vmem:[%s137_s3 + $0x28] sm:$0xff] %v2140_v14 }
 0xbfd   : > { %2157 = vst [vmem:[%s137_s3 + $0x20] sm:$0xff] %v2135_v19  ;;  %v2673_v3 = vpop.f32.mrb[36].mxu0 }
 0xbfe   : > { %v2150_v25 = vadd.f32 %v2673_v3, %v2007_v33  ;;  %v2144_v0 = vpop.f32.mrb[37].mxu0 }
 0xbff   : > { %v2145_v21 = vadd.f32 %v2144_v0, %v2007_v33 }
 0xc00   : > { %2160 = vst [vmem:[%s137_s3 + $0x38] sm:$0xff] %v2150_v25 }
 0xc01   : > { %2159 = vst [vmem:[%s137_s3 + $0x30] sm:$0xff] %v2145_v21 }
 0xc02   : > { %3130 = shalt.err (!%p3127_p3)
}
 0xc03   : > { %s3131_s23 = scalar_lea.hbm %s4511_s8, 1024  ;;  %s3135_s26 = scalar_lea.hbm %s4560_s2, 2048 }
 0xc04   : > { %p3132_p4 = scmp.ne.s32.totalorder %s4511_s8, %s3131_s23  ;;  %p3136_p9 = scmp.lt.u32.totalorder %s4511_s8, %s4560_s2 }
 0xc05   : > { %p3137_p10 = scmp.lt.u32.totalorder %s3135_s26, %s3131_s23  ;;  %p3139_p12 = scmp.lt.u32.totalorder %s3131_s23, %s4511_s8 }
 0xc06   : > { %p3133_p7 = pnand %p3132_p4, %p3239_p5 }
 0xc07   : > { %p3138_p11 = por %p3137_p10, %p3136_p9 }
 0xc08   : > { %p3134_p8 = pneg %p3133_p7 }
 0xc09   : > { %p3140_p13 = por %p3139_p12, %p3138_p11 }
 0xc0b   : > { %p3141_p0 = pnand %p3140_p13, %p3134_p8 }
 0xc0d   : > { %3144 = shalt.err (!%p3141_p0)
}
 0xc0e   : > { %s3184_s29 = smov 128   ;;  %s3185_s17 = smov 8  }
 0xc0f   : > { %2878 = dma.vmem_to_hbm [thread:$0]  (%p3239_p5), %s4513_s5, 1024, %s4511_s8, %s4517_s13, %s3184_s29, %s3184_s29, %s3185_s17  }
 0xc10 PF: > { %p2884_p1 = scmp.ge.s32.totalorder %s3179_s12, 2  ;;  %s2190_s30 = sand.u32 1, %s3167_s9  }
 0xc11   : > { %s2191_s3 = scalar_lea.sflag [#allocation3], %s2190_s30 }
 0xc12   : > { %p2881_p2 = pnand %p2884_p1, %p3243_p6 }
 0xc14   : > { %3162 = dma.done.wait (!%p2881_p2), %s2191_s3, 1024  }
 0xc15   : > { %3164 = vsyncadd (!%p2881_p2), %s2191_s3, 4294966272  ;;  %p12_p3 = scmp.ge.s32.totalorder %s3226_s15, 4   ;;  %s4573_s9 = smov %s3171_s10 }
 0xc16   : > { %s4574_s10 = smov %s3175_s11  ;;  %s4575_s11 = smov %s3237_s18 }
 0xc17   : > { %s4576_s12 = smov %s3226_s15  ;;  %14 = sbr.rel (!%p12_p3) target bundleno = 3 (0x3), region = 63 }
 0xc1e   :  { %2196 = vsyncpa [#allocation3], 1 }
 0xc1f   :  { %2198 = vsyncpa [#allocation3 + $0x1], 1 }

</bundles_post_ra>
